<compile_context>
chip_gen: v6e
topology: v6e:2x2x1
jax: 0.10.0
libtpu: 0.0.40
codegen_flags: <defaults>
</compile_context>

<pallas_src>
import jax
import jax.numpy as jnp
import numpy as np
from jax import lax
from jax.experimental import pallas as pl
from jax.experimental.pallas import tpu as pltpu


def _lstm_rnn_kernel(x_ref, wih_ref, whh_ref, b_ref, wout_ref, bout_ref,
                     out_ref, hN_ref, cN_ref, hall_ref, xw_ref):
    """Sequential LSTM over the whole (lane-padded) sequence + Linear head.

    x_ref    : (S, Hp)       raw inputs, zero-padded to Hp lanes
    wih_ref  : (Hp, 4*Hp)    W_ih^T, one 128-lane-aligned block per gate
    whh_ref  : (Hp, 4*Hp)    W_hh^T, same layout
    b_ref    : (1, 4*Hp)     b_ih + b_hh, padded per gate block
    wout_ref : (1, Hp)       W_out row vector (padded)
    bout_ref : (1, 1)        b_out
    out_ref  : (S, 1)        per-step linear head output
    hN_ref   : (1, Hp)       final hidden state (padded lanes stay 0)
    cN_ref   : (1, Hp)       final cell state   (padded lanes stay 0)
    hall_ref : (S, Hp)  VMEM scratch: h_t for every step
    xw_ref   : (S, 4Hp) VMEM scratch: hoisted input projection
    """
    S = x_ref.shape[0]
    Hp = x_ref.shape[1]

    # ---- hoisted, h-independent work: one wide MXU matmul for all timesteps.
    x_all = jnp.maximum(x_ref[...], 0.0)                     # F.relu(inputs)
    xw_ref[...] = (jnp.dot(x_all, wih_ref[...],
                           preferred_element_type=jnp.float32)
                   + b_ref[...])

    # Loop-invariant recurrent weight: load once, keep vreg-resident.
    whh = whh_ref[...]

    def step(t, carry):
        h, c = carry
        gates = (xw_ref[pl.ds(t, 1), :]
                 + jnp.dot(h, whh, preferred_element_type=jnp.float32))
        # 128-lane-aligned gate slices -> no cross-lane shuffles.
        i_g = jax.nn.sigmoid(gates[:, 0 * Hp:1 * Hp])
        f_g = jax.nn.sigmoid(gates[:, 1 * Hp:2 * Hp])
        g_g = jnp.tanh(gates[:, 2 * Hp:3 * Hp])
        o_g = jax.nn.sigmoid(gates[:, 3 * Hp:4 * Hp])
        c_new = f_g * c + i_g * g_g
        h_new = o_g * jnp.tanh(c_new)
        hall_ref[pl.ds(t, 1), :] = h_new
        return (h_new, c_new)

    h0 = jnp.zeros((1, Hp), jnp.float32)
    c0 = jnp.zeros((1, Hp), jnp.float32)
    # Static trip count -> fully unrolled for LLO scheduling visibility.
    h_fin, c_fin = lax.fori_loop(0, S, step, (h0, c0), unroll=True)

    # TODO(synk): nn.Dropout(p=0.05) is treated as identity (eval semantics);
    # training-mode random masking is not reproduced here.

    # Linear head (out_features=1) over all timesteps at once on the VPU
    # (multiply + lane reduce); an (S,Hp)@(Hp,1) MXU matmul would waste columns.
    out_ref[...] = (jnp.sum(hall_ref[...] * wout_ref[...],
                            axis=1, keepdims=True)
                    + bout_ref[...])
    hN_ref[...] = h_fin
    cN_ref[...] = c_fin


def rnn_forward(x, w_ih, w_hh, b_ih, b_hh, w_out, b_out):
    """Pallas implementation of RNN.forward(inputs, hidden=None).

    x:     (S, H) float32          (the module views it as (S, 1, H))
    w_ih:  (4H, H), w_hh: (4H, H), b_ih/b_hh: (4H,)   -- PyTorch LSTM layout
    w_out: (1, H), b_out: (1,)                         -- PyTorch Linear layout
    Returns (outputs, (h_n, c_n)): outputs has shape (S,) (the .squeeze()),
    h_n/c_n have shape (1, 1, H) (num_layers, batch, hidden).
    """
    x = jnp.asarray(x, jnp.float32)
    w_ih = jnp.asarray(w_ih, jnp.float32)
    w_hh = jnp.asarray(w_hh, jnp.float32)
    b_ih = jnp.asarray(b_ih, jnp.float32)
    b_hh = jnp.asarray(b_hh, jnp.float32)
    w_out = jnp.asarray(w_out, jnp.float32)
    b_out = jnp.asarray(b_out, jnp.float32)

    S, in_dim = x.shape
    H = w_hh.shape[1]
    # The module uses input_size == hidden_size == vocabsize; the gate packing
    # below relies on it, so enforce it explicitly (review correctness note).
    assert in_dim == H, f"input dim {in_dim} must equal hidden size {H}"
    assert w_ih.shape == (4 * H, H) and w_hh.shape == (4 * H, H)
    assert b_ih.shape == (4 * H,) and b_hh.shape == (4 * H,)
    assert w_out.shape == (1, H) and b_out.shape == (1,)

    Hp = ((H + 127) // 128) * 128          # 128-lane-aligned hidden size

    def pack_w(w):      # (4H, H) -> (Hp, 4*Hp): transposed, one block per gate
        blocks = []
        for g in range(4):
            blk = w[g * H:(g + 1) * H, :].T                     # (H, H)
            blocks.append(jnp.pad(blk, ((0, Hp - H), (0, Hp - H))))
        return jnp.concatenate(blocks, axis=1)                   # (Hp, 4*Hp)

    def pack_b(b):      # (4H,) -> (1, 4*Hp)
        blocks = [jnp.pad(b[g * H:(g + 1) * H], (0, Hp - H)) for g in range(4)]
        return jnp.concatenate(blocks).reshape(1, 4 * Hp)

    wih_p = pack_w(w_ih)
    whh_p = pack_w(w_hh)
    b_p = pack_b(b_ih + b_hh)
    wout_p = jnp.pad(w_out, ((0, 0), (0, Hp - H)))               # (1, Hp)
    bout_p = b_out.reshape(1, 1)
    x_p = jnp.pad(x, ((0, 0), (0, Hp - H)))                      # (S, Hp)

    vmem = pl.BlockSpec(memory_space=pltpu.MemorySpace.VMEM)
    cost = pl.CostEstimate(
        flops=int(4 * S * H * 4 * H + 2 * S * H),
        transcendentals=int(5 * S * H),
        bytes_accessed=int(4 * (x.size + w_ih.size + w_hh.size + b_ih.size
                                + b_hh.size + w_out.size + b_out.size
                                + S + 2 * H)),
    )

    out, h_n, c_n = pl.pallas_call(
        _lstm_rnn_kernel,
        out_shape=(
            jax.ShapeDtypeStruct((S, 1), jnp.float32),
            jax.ShapeDtypeStruct((1, Hp), jnp.float32),
            jax.ShapeDtypeStruct((1, Hp), jnp.float32),
        ),
        in_specs=[vmem] * 6,
        out_specs=(vmem, vmem, vmem),
        scratch_shapes=[pltpu.VMEM((S, Hp), jnp.float32),        # hall
                        pltpu.VMEM((S, 4 * Hp), jnp.float32)],   # xw
        cost_estimate=cost,
    )(x_p, wih_p, whh_p, b_p, wout_p, bout_p)

    outputs = out.reshape(S)                 # (S, 1, 1).squeeze() -> (S,)
    hidden = (h_n[:, :H].reshape(1, 1, H), c_n[:, :H].reshape(1, 1, H))
    return outputs, hidden


def _reference_forward(x, w_ih, w_hh, b_ih, b_hh, w_out, b_out):
    """Pure-JAX reference mirroring the PyTorch forward (eval-mode dropout)."""
    S, H = x.shape
    x = jnp.maximum(x, 0.0)
    h = jnp.zeros((H,), jnp.float32)
    c = jnp.zeros((H,), jnp.float32)
    hs = []
    for t in range(S):
        gates = w_ih @ x[t] + b_ih + w_hh @ h + b_hh
        i = jax.nn.sigmoid(gates[0 * H:1 * H])
        f = jax.nn.sigmoid(gates[1 * H:2 * H])
        g = jnp.tanh(gates[2 * H:3 * H])
        o = jax.nn.sigmoid(gates[3 * H:4 * H])
        c = f * c + i * g
        h = o * jnp.tanh(c)
        hs.append(h)
    hs = jnp.stack(hs)                              # (S, H)
    out = hs @ w_out.T + b_out                      # (S, 1)
    return out.reshape(S), (h.reshape(1, 1, H), c.reshape(1, 1, H))


if __name__ == "__main__":
    # Small, LSTM-consistent shapes: seq=8 timesteps, vocabsize(=hidden)=32.
    S, H = 8, 32
    key = jax.random.PRNGKey(0)
    kx, k1, k2, k3, k4, k5, k6 = jax.random.split(key, 7)

    bound = 1.0 / np.sqrt(H)
    x = jax.random.normal(kx, (S, H), jnp.float32)
    w_ih = jax.random.uniform(k1, (4 * H, H), jnp.float32, -bound, bound)
    w_hh = jax.random.uniform(k2, (4 * H, H), jnp.float32, -bound, bound)
    b_ih = jax.random.uniform(k3, (4 * H,), jnp.float32, -bound, bound)
    b_hh = jax.random.uniform(k4, (4 * H,), jnp.float32, -bound, bound)
    w_out = jax.random.uniform(k5, (1, H), jnp.float32, -bound, bound)
    b_out = jax.random.uniform(k6, (1,), jnp.float32, -bound, bound)

    outputs, (h_n, c_n) = rnn_forward(x, w_ih, w_hh, b_ih, b_hh, w_out, b_out)
    jax.block_until_ready((outputs, h_n, c_n))

    ref_out, (ref_h, ref_c) = _reference_forward(
        x, w_ih, w_hh, b_ih, b_hh, w_out, b_out)
    assert outputs.shape == (S,)
    assert h_n.shape == (1, 1, H) and c_n.shape == (1, 1, H)
    np.testing.assert_allclose(np.asarray(outputs), np.asarray(ref_out),
                               rtol=1e-5, atol=1e-5)
    np.testing.assert_allclose(np.asarray(h_n), np.asarray(ref_h),
                               rtol=1e-5, atol=1e-5)
    np.testing.assert_allclose(np.asarray(c_n), np.asarray(ref_c),
                               rtol=1e-5, atol=1e-5)
    print("KERNEL_OK")
</pallas_src>

<mosaic_0001>
module attributes {stable_mosaic.version = 11 : i64} {
  func.func @_lstm_rnn_kernel(%arg0: memref<8x128xf32, #tpu.memory_space<vmem>>, %arg1: memref<128x512xf32, #tpu.memory_space<vmem>>, %arg2: memref<128x512xf32, #tpu.memory_space<vmem>>, %arg3: memref<1x512xf32, #tpu.memory_space<vmem>>, %arg4: memref<1x128xf32, #tpu.memory_space<vmem>>, %arg5: memref<1x1xf32, #tpu.memory_space<vmem>>, %arg6: memref<8x1xf32, #tpu.memory_space<vmem>>, %arg7: memref<1x128xf32, #tpu.memory_space<vmem>>, %arg8: memref<1x128xf32, #tpu.memory_space<vmem>>, %arg9: memref<8x128xf32, #tpu.memory_space<vmem>>, %arg10: memref<8x512xf32, #tpu.memory_space<vmem>>) attributes {dimension_semantics = [], scalar_prefetch = 0 : i64, scratch_operands = 2 : i64, tpu.core_type = #tpu.core_type<tc>} {
    %c0 = arith.constant 0 : index
    %c0_0 = arith.constant 0 : index
    %0 = vector.load %arg0[%c0, %c0_0] : memref<8x128xf32, #tpu.memory_space<vmem>>, vector<8x128xf32>
    %cst = arith.constant 0.000000e+00 : f32
    %1 = vector.broadcast %cst : f32 to vector<8x128xf32>
    %2 = arith.maximumf %0, %1 : vector<8x128xf32>
    %c0_1 = arith.constant 0 : index
    %c0_2 = arith.constant 0 : index
    %3 = vector.load %arg1[%c0_1, %c0_2] : memref<128x512xf32, #tpu.memory_space<vmem>>, vector<128x512xf32>
    %cst_3 = arith.constant dense<0.000000e+00> : vector<8x512xf32>
    %4 = tpu.matmul %2, %3, %cst_3 {dimension_numbers = #tpu.dot_dimension_numbers<[1], [0], [0], [1], [0, 0, 1, 1], [], []>} : vector<8x128xf32>, vector<128x512xf32>, vector<8x512xf32> -> vector<8x512xf32>
    %c0_4 = arith.constant 0 : index
    %c0_5 = arith.constant 0 : index
    %5 = vector.load %arg3[%c0_4, %c0_5] : memref<1x512xf32, #tpu.memory_space<vmem>>, vector<1x512xf32>
    %6 = vector.broadcast %5 : vector<1x512xf32> to vector<8x512xf32>
    %7 = arith.addf %4, %6 : vector<8x512xf32>
    %c0_6 = arith.constant 0 : index
    %c0_7 = arith.constant 0 : index
    %8 = vector.load %arg10[%c0_6, %c0_7] : memref<8x512xf32, #tpu.memory_space<vmem>>, vector<8x512xf32>
    tpu.vector_store %arg10[%c0_6, %c0_7], %7 {strides = array<i32>} : memref<8x512xf32, #tpu.memory_space<vmem>>, vector<8x512xf32>,
    %c0_8 = arith.constant 0 : index
    %c0_9 = arith.constant 0 : index
    %9 = vector.load %arg2[%c0_8, %c0_9] : memref<128x512xf32, #tpu.memory_space<vmem>>, vector<128x512xf32>
    %cst_10 = arith.constant 0.000000e+00 : f32
    %10 = vector.broadcast %cst_10 : f32 to vector<1x128xf32>
    %cst_11 = arith.constant 0.000000e+00 : f32
    %11 = vector.broadcast %cst_11 : f32 to vector<1x128xf32>
    %c0_i32 = arith.constant 0 : i32
    %12 = arith.index_cast %c0_i32 : i32 to index
    %c0_12 = arith.constant 0 : index
    %13 = vector.load %arg10[%12, %c0_12] : memref<8x512xf32, #tpu.memory_space<vmem>>, vector<1x512xf32>
    %cst_13 = arith.constant dense<0.000000e+00> : vector<1x512xf32>
    %14 = tpu.matmul %10, %9, %cst_13 {dimension_numbers = #tpu.dot_dimension_numbers<[1], [0], [0], [1], [0, 0, 1, 1], [], []>} : vector<1x128xf32>, vector<128x512xf32>, vector<1x512xf32> -> vector<1x512xf32>
    %15 = arith.addf %13, %14 : vector<1x512xf32>
    %16 = vector.extract_strided_slice %15 {offsets = [0, 0], sizes = [1, 128], strides = [1, 1]} : vector<1x512xf32> to vector<1x128xf32>
    %17 = arith.negf %16 : vector<1x128xf32>
    %18 = math.exp %17 : vector<1x128xf32>
    %cst_14 = arith.constant 1.000000e+00 : f32
    %19 = vector.broadcast %cst_14 : f32 to vector<1x128xf32>
    %20 = arith.addf %19, %18 : vector<1x128xf32>
    %21 = arith.divf %19, %20 : vector<1x128xf32>
    %22 = vector.extract_strided_slice %15 {offsets = [0, 128], sizes = [1, 128], strides = [1, 1]} : vector<1x512xf32> to vector<1x128xf32>
    %23 = arith.negf %22 : vector<1x128xf32>
    %24 = math.exp %23 : vector<1x128xf32>
    %cst_15 = arith.constant 1.000000e+00 : f32
    %25 = vector.broadcast %cst_15 : f32 to vector<1x128xf32>
    %26 = arith.addf %25, %24 : vector<1x128xf32>
    %27 = arith.divf %25, %26 : vector<1x128xf32>
    %28 = vector.extract_strided_slice %15 {offsets = [0, 256], sizes = [1, 128], strides = [1, 1]} : vector<1x512xf32> to vector<1x128xf32>
    %29 = math.tanh %28 : vector<1x128xf32>
    %30 = vector.extract_strided_slice %15 {offsets = [0, 384], sizes = [1, 128], strides = [1, 1]} : vector<1x512xf32> to vector<1x128xf32>
    %31 = arith.negf %30 : vector<1x128xf32>
    %32 = math.exp %31 : vector<1x128xf32>
    %cst_16 = arith.constant 1.000000e+00 : f32
    %33 = vector.broadcast %cst_16 : f32 to vector<1x128xf32>
    %34 = arith.addf %33, %32 : vector<1x128xf32>
    %35 = arith.divf %33, %34 : vector<1x128xf32>
    %36 = arith.mulf %27, %11 : vector<1x128xf32>
    %37 = arith.mulf %21, %29 : vector<1x128xf32>
    %38 = arith.addf %36, %37 : vector<1x128xf32>
    %39 = math.tanh %38 : vector<1x128xf32>
    %40 = arith.mulf %35, %39 : vector<1x128xf32>
    %41 = arith.index_cast %c0_i32 : i32 to index
    %c0_17 = arith.constant 0 : index
    %42 = vector.load %arg9[%41, %c0_17] : memref<8x128xf32, #tpu.memory_space<vmem>>, vector<1x128xf32>
    tpu.vector_store %arg9[%41, %c0_17], %40 {strides = array<i32>} : memref<8x128xf32, #tpu.memory_space<vmem>>, vector<1x128xf32>,
    %c1_i32 = arith.constant 1 : i32
    %43 = arith.index_cast %c1_i32 : i32 to index
    %c0_18 = arith.constant 0 : index
    %44 = vector.load %arg10[%43, %c0_18] : memref<8x512xf32, #tpu.memory_space<vmem>>, vector<1x512xf32>
    %cst_19 = arith.constant dense<0.000000e+00> : vector<1x512xf32>
    %45 = tpu.matmul %40, %9, %cst_19 {dimension_numbers = #tpu.dot_dimension_numbers<[1], [0], [0], [1], [0, 0, 1, 1], [], []>} : vector<1x128xf32>, vector<128x512xf32>, vector<1x512xf32> -> vector<1x512xf32>
    %46 = arith.addf %44, %45 : vector<1x512xf32>
    %47 = vector.extract_strided_slice %46 {offsets = [0, 0], sizes = [1, 128], strides = [1, 1]} : vector<1x512xf32> to vector<1x128xf32>
    %48 = arith.negf %47 : vector<1x128xf32>
    %49 = math.exp %48 : vector<1x128xf32>
    %cst_20 = arith.constant 1.000000e+00 : f32
    %50 = vector.broadcast %cst_20 : f32 to vector<1x128xf32>
    %51 = arith.addf %50, %49 : vector<1x128xf32>
    %52 = arith.divf %50, %51 : vector<1x128xf32>
    %53 = vector.extract_strided_slice %46 {offsets = [0, 128], sizes = [1, 128], strides = [1, 1]} : vector<1x512xf32> to vector<1x128xf32>
    %54 = arith.negf %53 : vector<1x128xf32>
    %55 = math.exp %54 : vector<1x128xf32>
    %cst_21 = arith.constant 1.000000e+00 : f32
    %56 = vector.broadcast %cst_21 : f32 to vector<1x128xf32>
    %57 = arith.addf %56, %55 : vector<1x128xf32>
    %58 = arith.divf %56, %57 : vector<1x128xf32>
    %59 = vector.extract_strided_slice %46 {offsets = [0, 256], sizes = [1, 128], strides = [1, 1]} : vector<1x512xf32> to vector<1x128xf32>
    %60 = math.tanh %59 : vector<1x128xf32>
    %61 = vector.extract_strided_slice %46 {offsets = [0, 384], sizes = [1, 128], strides = [1, 1]} : vector<1x512xf32> to vector<1x128xf32>
    %62 = arith.negf %61 : vector<1x128xf32>
    %63 = math.exp %62 : vector<1x128xf32>
    %cst_22 = arith.constant 1.000000e+00 : f32
    %64 = vector.broadcast %cst_22 : f32 to vector<1x128xf32>
    %65 = arith.addf %64, %63 : vector<1x128xf32>
    %66 = arith.divf %64, %65 : vector<1x128xf32>
    %67 = arith.mulf %58, %38 : vector<1x128xf32>
    %68 = arith.mulf %52, %60 : vector<1x128xf32>
    %69 = arith.addf %67, %68 : vector<1x128xf32>
    %70 = math.tanh %69 : vector<1x128xf32>
    %71 = arith.mulf %66, %70 : vector<1x128xf32>
    %72 = arith.index_cast %c1_i32 : i32 to index
    %c0_23 = arith.constant 0 : index
    %73 = vector.load %arg9[%72, %c0_23] : memref<8x128xf32, #tpu.memory_space<vmem>>, vector<1x128xf32>
    tpu.vector_store %arg9[%72, %c0_23], %71 {strides = array<i32>} : memref<8x128xf32, #tpu.memory_space<vmem>>, vector<1x128xf32>,
    %c2_i32 = arith.constant 2 : i32
    %74 = arith.index_cast %c2_i32 : i32 to index
    %c0_24 = arith.constant 0 : index
    %75 = vector.load %arg10[%74, %c0_24] : memref<8x512xf32, #tpu.memory_space<vmem>>, vector<1x512xf32>
    %cst_25 = arith.constant dense<0.000000e+00> : vector<1x512xf32>
    %76 = tpu.matmul %71, %9, %cst_25 {dimension_numbers = #tpu.dot_dimension_numbers<[1], [0], [0], [1], [0, 0, 1, 1], [], []>} : vector<1x128xf32>, vector<128x512xf32>, vector<1x512xf32> -> vector<1x512xf32>
    %77 = arith.addf %75, %76 : vector<1x512xf32>
    %78 = vector.extract_strided_slice %77 {offsets = [0, 0], sizes = [1, 128], strides = [1, 1]} : vector<1x512xf32> to vector<1x128xf32>
    %79 = arith.negf %78 : vector<1x128xf32>
    %80 = math.exp %79 : vector<1x128xf32>
    %cst_26 = arith.constant 1.000000e+00 : f32
    %81 = vector.broadcast %cst_26 : f32 to vector<1x128xf32>
    %82 = arith.addf %81, %80 : vector<1x128xf32>
    %83 = arith.divf %81, %82 : vector<1x128xf32>
    %84 = vector.extract_strided_slice %77 {offsets = [0, 128], sizes = [1, 128], strides = [1, 1]} : vector<1x512xf32> to vector<1x128xf32>
    %85 = arith.negf %84 : vector<1x128xf32>
    %86 = math.exp %85 : vector<1x128xf32>
    %cst_27 = arith.constant 1.000000e+00 : f32
    %87 = vector.broadcast %cst_27 : f32 to vector<1x128xf32>
    %88 = arith.addf %87, %86 : vector<1x128xf32>
    %89 = arith.divf %87, %88 : vector<1x128xf32>
    %90 = vector.extract_strided_slice %77 {offsets = [0, 256], sizes = [1, 128], strides = [1, 1]} : vector<1x512xf32> to vector<1x128xf32>
    %91 = math.tanh %90 : vector<1x128xf32>
    %92 = vector.extract_strided_slice %77 {offsets = [0, 384], sizes = [1, 128], strides = [1, 1]} : vector<1x512xf32> to vector<1x128xf32>
    %93 = arith.negf %92 : vector<1x128xf32>
    %94 = math.exp %93 : vector<1x128xf32>
    %cst_28 = arith.constant 1.000000e+00 : f32
    %95 = vector.broadcast %cst_28 : f32 to vector<1x128xf32>
    %96 = arith.addf %95, %94 : vector<1x128xf32>
    %97 = arith.divf %95, %96 : vector<1x128xf32>
    %98 = arith.mulf %89, %69 : vector<1x128xf32>
    %99 = arith.mulf %83, %91 : vector<1x128xf32>
    %100 = arith.addf %98, %99 : vector<1x128xf32>
    %101 = math.tanh %100 : vector<1x128xf32>
    %102 = arith.mulf %97, %101 : vector<1x128xf32>
    %103 = arith.index_cast %c2_i32 : i32 to index
    %c0_29 = arith.constant 0 : index
    %104 = vector.load %arg9[%103, %c0_29] : memref<8x128xf32, #tpu.memory_space<vmem>>, vector<1x128xf32>
    tpu.vector_store %arg9[%103, %c0_29], %102 {strides = array<i32>} : memref<8x128xf32, #tpu.memory_space<vmem>>, vector<1x128xf32>,
    %c3_i32 = arith.constant 3 : i32
    %105 = arith.index_cast %c3_i32 : i32 to index
    %c0_30 = arith.constant 0 : index
    %106 = vector.load %arg10[%105, %c0_30] : memref<8x512xf32, #tpu.memory_space<vmem>>, vector<1x512xf32>
    %cst_31 = arith.constant dense<0.000000e+00> : vector<1x512xf32>
    %107 = tpu.matmul %102, %9, %cst_31 {dimension_numbers = #tpu.dot_dimension_numbers<[1], [0], [0], [1], [0, 0, 1, 1], [], []>} : vector<1x128xf32>, vector<128x512xf32>, vector<1x512xf32> -> vector<1x512xf32>
    %108 = arith.addf %106, %107 : vector<1x512xf32>
    %109 = vector.extract_strided_slice %108 {offsets = [0, 0], sizes = [1, 128], strides = [1, 1]} : vector<1x512xf32> to vector<1x128xf32>
    %110 = arith.negf %109 : vector<1x128xf32>
    %111 = math.exp %110 : vector<1x128xf32>
    %cst_32 = arith.constant 1.000000e+00 : f32
    %112 = vector.broadcast %cst_32 : f32 to vector<1x128xf32>
    %113 = arith.addf %112, %111 : vector<1x128xf32>
    %114 = arith.divf %112, %113 : vector<1x128xf32>
    %115 = vector.extract_strided_slice %108 {offsets = [0, 128], sizes = [1, 128], strides = [1, 1]} : vector<1x512xf32> to vector<1x128xf32>
    %116 = arith.negf %115 : vector<1x128xf32>
    %117 = math.exp %116 : vector<1x128xf32>
    %cst_33 = arith.constant 1.000000e+00 : f32
    %118 = vector.broadcast %cst_33 : f32 to vector<1x128xf32>
    %119 = arith.addf %118, %117 : vector<1x128xf32>
    %120 = arith.divf %118, %119 : vector<1x128xf32>
    %121 = vector.extract_strided_slice %108 {offsets = [0, 256], sizes = [1, 128], strides = [1, 1]} : vector<1x512xf32> to vector<1x128xf32>
    %122 = math.tanh %121 : vector<1x128xf32>
    %123 = vector.extract_strided_slice %108 {offsets = [0, 384], sizes = [1, 128], strides = [1, 1]} : vector<1x512xf32> to vector<1x128xf32>
    %124 = arith.negf %123 : vector<1x128xf32>
    %125 = math.exp %124 : vector<1x128xf32>
    %cst_34 = arith.constant 1.000000e+00 : f32
    %126 = vector.broadcast %cst_34 : f32 to vector<1x128xf32>
    %127 = arith.addf %126, %125 : vector<1x128xf32>
    %128 = arith.divf %126, %127 : vector<1x128xf32>
    %129 = arith.mulf %120, %100 : vector<1x128xf32>
    %130 = arith.mulf %114, %122 : vector<1x128xf32>
    %131 = arith.addf %129, %130 : vector<1x128xf32>
    %132 = math.tanh %131 : vector<1x128xf32>
    %133 = arith.mulf %128, %132 : vector<1x128xf32>
    %134 = arith.index_cast %c3_i32 : i32 to index
    %c0_35 = arith.constant 0 : index
    %135 = vector.load %arg9[%134, %c0_35] : memref<8x128xf32, #tpu.memory_space<vmem>>, vector<1x128xf32>
    tpu.vector_store %arg9[%134, %c0_35], %133 {strides = array<i32>} : memref<8x128xf32, #tpu.memory_space<vmem>>, vector<1x128xf32>,
    %c4_i32 = arith.constant 4 : i32
    %136 = arith.index_cast %c4_i32 : i32 to index
    %c0_36 = arith.constant 0 : index
    %137 = vector.load %arg10[%136, %c0_36] : memref<8x512xf32, #tpu.memory_space<vmem>>, vector<1x512xf32>
    %cst_37 = arith.constant dense<0.000000e+00> : vector<1x512xf32>
    %138 = tpu.matmul %133, %9, %cst_37 {dimension_numbers = #tpu.dot_dimension_numbers<[1], [0], [0], [1], [0, 0, 1, 1], [], []>} : vector<1x128xf32>, vector<128x512xf32>, vector<1x512xf32> -> vector<1x512xf32>
    %139 = arith.addf %137, %138 : vector<1x512xf32>
    %140 = vector.extract_strided_slice %139 {offsets = [0, 0], sizes = [1, 128], strides = [1, 1]} : vector<1x512xf32> to vector<1x128xf32>
    %141 = arith.negf %140 : vector<1x128xf32>
    %142 = math.exp %141 : vector<1x128xf32>
    %cst_38 = arith.constant 1.000000e+00 : f32
    %143 = vector.broadcast %cst_38 : f32 to vector<1x128xf32>
    %144 = arith.addf %143, %142 : vector<1x128xf32>
    %145 = arith.divf %143, %144 : vector<1x128xf32>
    %146 = vector.extract_strided_slice %139 {offsets = [0, 128], sizes = [1, 128], strides = [1, 1]} : vector<1x512xf32> to vector<1x128xf32>
    %147 = arith.negf %146 : vector<1x128xf32>
    %148 = math.exp %147 : vector<1x128xf32>
    %cst_39 = arith.constant 1.000000e+00 : f32
    %149 = vector.broadcast %cst_39 : f32 to vector<1x128xf32>
    %150 = arith.addf %149, %148 : vector<1x128xf32>
    %151 = arith.divf %149, %150 : vector<1x128xf32>
    %152 = vector.extract_strided_slice %139 {offsets = [0, 256], sizes = [1, 128], strides = [1, 1]} : vector<1x512xf32> to vector<1x128xf32>
    %153 = math.tanh %152 : vector<1x128xf32>
    %154 = vector.extract_strided_slice %139 {offsets = [0, 384], sizes = [1, 128], strides = [1, 1]} : vector<1x512xf32> to vector<1x128xf32>
    %155 = arith.negf %154 : vector<1x128xf32>
    %156 = math.exp %155 : vector<1x128xf32>
    %cst_40 = arith.constant 1.000000e+00 : f32
    %157 = vector.broadcast %cst_40 : f32 to vector<1x128xf32>
    %158 = arith.addf %157, %156 : vector<1x128xf32>
    %159 = arith.divf %157, %158 : vector<1x128xf32>
    %160 = arith.mulf %151, %131 : vector<1x128xf32>
    %161 = arith.mulf %145, %153 : vector<1x128xf32>
    %162 = arith.addf %160, %161 : vector<1x128xf32>
    %163 = math.tanh %162 : vector<1x128xf32>
    %164 = arith.mulf %159, %163 : vector<1x128xf32>
    %165 = arith.index_cast %c4_i32 : i32 to index
    %c0_41 = arith.constant 0 : index
    %166 = vector.load %arg9[%165, %c0_41] : memref<8x128xf32, #tpu.memory_space<vmem>>, vector<1x128xf32>
    tpu.vector_store %arg9[%165, %c0_41], %164 {strides = array<i32>} : memref<8x128xf32, #tpu.memory_space<vmem>>, vector<1x128xf32>,
    %c5_i32 = arith.constant 5 : i32
    %167 = arith.index_cast %c5_i32 : i32 to index
    %c0_42 = arith.constant 0 : index
    %168 = vector.load %arg10[%167, %c0_42] : memref<8x512xf32, #tpu.memory_space<vmem>>, vector<1x512xf32>
    %cst_43 = arith.constant dense<0.000000e+00> : vector<1x512xf32>
    %169 = tpu.matmul %164, %9, %cst_43 {dimension_numbers = #tpu.dot_dimension_numbers<[1], [0], [0], [1], [0, 0, 1, 1], [], []>} : vector<1x128xf32>, vector<128x512xf32>, vector<1x512xf32> -> vector<1x512xf32>
    %170 = arith.addf %168, %169 : vector<1x512xf32>
    %171 = vector.extract_strided_slice %170 {offsets = [0, 0], sizes = [1, 128], strides = [1, 1]} : vector<1x512xf32> to vector<1x128xf32>
    %172 = arith.negf %171 : vector<1x128xf32>
    %173 = math.exp %172 : vector<1x128xf32>
    %cst_44 = arith.constant 1.000000e+00 : f32
    %174 = vector.broadcast %cst_44 : f32 to vector<1x128xf32>
    %175 = arith.addf %174, %173 : vector<1x128xf32>
    %176 = arith.divf %174, %175 : vector<1x128xf32>
    %177 = vector.extract_strided_slice %170 {offsets = [0, 128], sizes = [1, 128], strides = [1, 1]} : vector<1x512xf32> to vector<1x128xf32>
    %178 = arith.negf %177 : vector<1x128xf32>
    %179 = math.exp %178 : vector<1x128xf32>
    %cst_45 = arith.constant 1.000000e+00 : f32
    %180 = vector.broadcast %cst_45 : f32 to vector<1x128xf32>
    %181 = arith.addf %180, %179 : vector<1x128xf32>
    %182 = arith.divf %180, %181 : vector<1x128xf32>
    %183 = vector.extract_strided_slice %170 {offsets = [0, 256], sizes = [1, 128], strides = [1, 1]} : vector<1x512xf32> to vector<1x128xf32>
    %184 = math.tanh %183 : vector<1x128xf32>
    %185 = vector.extract_strided_slice %170 {offsets = [0, 384], sizes = [1, 128], strides = [1, 1]} : vector<1x512xf32> to vector<1x128xf32>
    %186 = arith.negf %185 : vector<1x128xf32>
    %187 = math.exp %186 : vector<1x128xf32>
    %cst_46 = arith.constant 1.000000e+00 : f32
    %188 = vector.broadcast %cst_46 : f32 to vector<1x128xf32>
    %189 = arith.addf %188, %187 : vector<1x128xf32>
    %190 = arith.divf %188, %189 : vector<1x128xf32>
    %191 = arith.mulf %182, %162 : vector<1x128xf32>
    %192 = arith.mulf %176, %184 : vector<1x128xf32>
    %193 = arith.addf %191, %192 : vector<1x128xf32>
    %194 = math.tanh %193 : vector<1x128xf32>
    %195 = arith.mulf %190, %194 : vector<1x128xf32>
    %196 = arith.index_cast %c5_i32 : i32 to index
    %c0_47 = arith.constant 0 : index
    %197 = vector.load %arg9[%196, %c0_47] : memref<8x128xf32, #tpu.memory_space<vmem>>, vector<1x128xf32>
    tpu.vector_store %arg9[%196, %c0_47], %195 {strides = array<i32>} : memref<8x128xf32, #tpu.memory_space<vmem>>, vector<1x128xf32>,
    %c6_i32 = arith.constant 6 : i32
    %198 = arith.index_cast %c6_i32 : i32 to index
    %c0_48 = arith.constant 0 : index
    %199 = vector.load %arg10[%198, %c0_48] : memref<8x512xf32, #tpu.memory_space<vmem>>, vector<1x512xf32>
    %cst_49 = arith.constant dense<0.000000e+00> : vector<1x512xf32>
    %200 = tpu.matmul %195, %9, %cst_49 {dimension_numbers = #tpu.dot_dimension_numbers<[1], [0], [0], [1], [0, 0, 1, 1], [], []>} : vector<1x128xf32>, vector<128x512xf32>, vector<1x512xf32> -> vector<1x512xf32>
    %201 = arith.addf %199, %200 : vector<1x512xf32>
    %202 = vector.extract_strided_slice %201 {offsets = [0, 0], sizes = [1, 128], strides = [1, 1]} : vector<1x512xf32> to vector<1x128xf32>
    %203 = arith.negf %202 : vector<1x128xf32>
    %204 = math.exp %203 : vector<1x128xf32>
    %cst_50 = arith.constant 1.000000e+00 : f32
    %205 = vector.broadcast %cst_50 : f32 to vector<1x128xf32>
    %206 = arith.addf %205, %204 : vector<1x128xf32>
    %207 = arith.divf %205, %206 : vector<1x128xf32>
    %208 = vector.extract_strided_slice %201 {offsets = [0, 128], sizes = [1, 128], strides = [1, 1]} : vector<1x512xf32> to vector<1x128xf32>
    %209 = arith.negf %208 : vector<1x128xf32>
    %210 = math.exp %209 : vector<1x128xf32>
    %cst_51 = arith.constant 1.000000e+00 : f32
    %211 = vector.broadcast %cst_51 : f32 to vector<1x128xf32>
    %212 = arith.addf %211, %210 : vector<1x128xf32>
    %213 = arith.divf %211, %212 : vector<1x128xf32>
    %214 = vector.extract_strided_slice %201 {offsets = [0, 256], sizes = [1, 128], strides = [1, 1]} : vector<1x512xf32> to vector<1x128xf32>
    %215 = math.tanh %214 : vector<1x128xf32>
    %216 = vector.extract_strided_slice %201 {offsets = [0, 384], sizes = [1, 128], strides = [1, 1]} : vector<1x512xf32> to vector<1x128xf32>
    %217 = arith.negf %216 : vector<1x128xf32>
    %218 = math.exp %217 : vector<1x128xf32>
    %cst_52 = arith.constant 1.000000e+00 : f32
    %219 = vector.broadcast %cst_52 : f32 to vector<1x128xf32>
    %220 = arith.addf %219, %218 : vector<1x128xf32>
    %221 = arith.divf %219, %220 : vector<1x128xf32>
    %222 = arith.mulf %213, %193 : vector<1x128xf32>
    %223 = arith.mulf %207, %215 : vector<1x128xf32>
    %224 = arith.addf %222, %223 : vector<1x128xf32>
    %225 = math.tanh %224 : vector<1x128xf32>
    %226 = arith.mulf %221, %225 : vector<1x128xf32>
    %227 = arith.index_cast %c6_i32 : i32 to index
    %c0_53 = arith.constant 0 : index
    %228 = vector.load %arg9[%227, %c0_53] : memref<8x128xf32, #tpu.memory_space<vmem>>, vector<1x128xf32>
    tpu.vector_store %arg9[%227, %c0_53], %226 {strides = array<i32>} : memref<8x128xf32, #tpu.memory_space<vmem>>, vector<1x128xf32>,
    %c7_i32 = arith.constant 7 : i32
    %229 = arith.index_cast %c7_i32 : i32 to index
    %c0_54 = arith.constant 0 : index
    %230 = vector.load %arg10[%229, %c0_54] : memref<8x512xf32, #tpu.memory_space<vmem>>, vector<1x512xf32>
    %cst_55 = arith.constant dense<0.000000e+00> : vector<1x512xf32>
    %231 = tpu.matmul %226, %9, %cst_55 {dimension_numbers = #tpu.dot_dimension_numbers<[1], [0], [0], [1], [0, 0, 1, 1], [], []>} : vector<1x128xf32>, vector<128x512xf32>, vector<1x512xf32> -> vector<1x512xf32>
    %232 = arith.addf %230, %231 : vector<1x512xf32>
    %233 = vector.extract_strided_slice %232 {offsets = [0, 0], sizes = [1, 128], strides = [1, 1]} : vector<1x512xf32> to vector<1x128xf32>
    %234 = arith.negf %233 : vector<1x128xf32>
    %235 = math.exp %234 : vector<1x128xf32>
    %cst_56 = arith.constant 1.000000e+00 : f32
    %236 = vector.broadcast %cst_56 : f32 to vector<1x128xf32>
    %237 = arith.addf %236, %235 : vector<1x128xf32>
    %238 = arith.divf %236, %237 : vector<1x128xf32>
    %239 = vector.extract_strided_slice %232 {offsets = [0, 128], sizes = [1, 128], strides = [1, 1]} : vector<1x512xf32> to vector<1x128xf32>
    %240 = arith.negf %239 : vector<1x128xf32>
    %241 = math.exp %240 : vector<1x128xf32>
    %cst_57 = arith.constant 1.000000e+00 : f32
    %242 = vector.broadcast %cst_57 : f32 to vector<1x128xf32>
    %243 = arith.addf %242, %241 : vector<1x128xf32>
    %244 = arith.divf %242, %243 : vector<1x128xf32>
    %245 = vector.extract_strided_slice %232 {offsets = [0, 256], sizes = [1, 128], strides = [1, 1]} : vector<1x512xf32> to vector<1x128xf32>
    %246 = math.tanh %245 : vector<1x128xf32>
    %247 = vector.extract_strided_slice %232 {offsets = [0, 384], sizes = [1, 128], strides = [1, 1]} : vector<1x512xf32> to vector<1x128xf32>
    %248 = arith.negf %247 : vector<1x128xf32>
    %249 = math.exp %248 : vector<1x128xf32>
    %cst_58 = arith.constant 1.000000e+00 : f32
    %250 = vector.broadcast %cst_58 : f32 to vector<1x128xf32>
    %251 = arith.addf %250, %249 : vector<1x128xf32>
    %252 = arith.divf %250, %251 : vector<1x128xf32>
    %253 = arith.mulf %244, %224 : vector<1x128xf32>
    %254 = arith.mulf %238, %246 : vector<1x128xf32>
    %255 = arith.addf %253, %254 : vector<1x128xf32>
    %256 = math.tanh %255 : vector<1x128xf32>
    %257 = arith.mulf %252, %256 : vector<1x128xf32>
    %258 = arith.index_cast %c7_i32 : i32 to index
    %c0_59 = arith.constant 0 : index
    %259 = vector.load %arg9[%258, %c0_59] : memref<8x128xf32, #tpu.memory_space<vmem>>, vector<1x128xf32>
    tpu.vector_store %arg9[%258, %c0_59], %257 {strides = array<i32>} : memref<8x128xf32, #tpu.memory_space<vmem>>, vector<1x128xf32>,
    %c8_i32 = arith.constant 8 : i32
    %c0_60 = arith.constant 0 : index
    %c0_61 = arith.constant 0 : index
    %260 = vector.load %arg9[%c0_60, %c0_61] : memref<8x128xf32, #tpu.memory_space<vmem>>, vector<8x128xf32>
    %c0_62 = arith.constant 0 : index
    %c0_63 = arith.constant 0 : index
    %261 = vector.load %arg4[%c0_62, %c0_63] : memref<1x128xf32, #tpu.memory_space<vmem>>, vector<1x128xf32>
    %262 = vector.broadcast %261 : vector<1x128xf32> to vector<8x128xf32>
    %263 = arith.mulf %260, %262 : vector<8x128xf32>
    %cst_64 = arith.constant dense<0.000000e+00> : vector<8xf32>
    %264 = vector.multi_reduction <add>, %263, %cst_64 [1] : vector<8x128xf32> to vector<8xf32>
    %265 = vector.shape_cast %264 : vector<8xf32> to vector<8x1xf32>
    %c0_65 = arith.constant 0 : index
    %c0_66 = arith.constant 0 : index
    %266 = vector.load %arg5[%c0_65, %c0_66] : memref<1x1xf32, #tpu.memory_space<vmem>>, vector<1x1xf32>
    %267 = vector.broadcast %266 : vector<1x1xf32> to vector<8x1xf32>
    %268 = arith.addf %265, %267 : vector<8x1xf32>
    %c0_67 = arith.constant 0 : index
    %c0_68 = arith.constant 0 : index
    %269 = vector.load %arg6[%c0_67, %c0_68] : memref<8x1xf32, #tpu.memory_space<vmem>>, vector<8x1xf32>
    tpu.vector_store %arg6[%c0_67, %c0_68], %268 {strides = array<i32>} : memref<8x1xf32, #tpu.memory_space<vmem>>, vector<8x1xf32>,
    %c0_69 = arith.constant 0 : index
    %c0_70 = arith.constant 0 : index
    %270 = vector.load %arg7[%c0_69, %c0_70] : memref<1x128xf32, #tpu.memory_space<vmem>>, vector<1x128xf32>
    tpu.vector_store %arg7[%c0_69, %c0_70], %257 {strides = array<i32>} : memref<1x128xf32, #tpu.memory_space<vmem>>, vector<1x128xf32>,
    %c0_71 = arith.constant 0 : index
    %c0_72 = arith.constant 0 : index
    %271 = vector.load %arg8[%c0_71, %c0_72] : memref<1x128xf32, #tpu.memory_space<vmem>>, vector<1x128xf32>
    tpu.vector_store %arg8[%c0_71, %c0_72], %255 {strides = array<i32>} : memref<1x128xf32, #tpu.memory_space<vmem>>, vector<1x128xf32>,
    return
  }
}

</mosaic_0001>

<bundles_post_ra>
// kernel: tpu_custom_call.1
= control target key start
LH: loop header
LB: loop body
LE: loop exit
PB: predicated region body
PF: predicated region fallthrough
CT: control target
= control target key end

     0   :  { %s3325_s0 = inlined_call_operand.hbm [shape: f32[8,128], index: 0, kind: input, shape index: {}]   ;;  %s3326_s1 = inlined_call_operand.hbm [shape: f32[128,512], index: 1, kind: input, shape index: {}]   ;;  %s3327_s2 = inlined_call_operand.hbm [shape: f32[128,512], index: 2, kind: input, shape index: {}]   ;;  %s3328_s3 = inlined_call_operand.vmem [shape: f32[1,512], index: 3, kind: input, shape index: {}]   ;;  %s3329_s4 = inlined_call_operand.vmem [shape: f32[1,128], index: 4, kind: input, shape index: {}]   ;;  %s3330_s5 = inlined_call_operand.<no memory space> [shape: f32[1,1], index: 5, kind: input, shape index: {}]   ;;  %s3331_s6 = inlined_call_operand.vmem [shape: f32[8,1], index: 6, kind: output, shape index: {0}]   ;;  %s3332_s7 = inlined_call_operand.hbm [shape: f32[1,128], index: 7, kind: output, shape index: {1}]   ;;  %s3333_s8 = inlined_call_operand.hbm [shape: f32[1,128], index: 8, kind: output, shape index: {2}]  }
   0x1   :  { %v14_v0 = vstv %s3330_s5 }
   0x2   :  { %15 = vst [vmem:[#allocation4] sm:$0x1] %v14_v0 }
   0x3   :  { %16 = vsyncpa [#allocation6], 0 }
   0x4   :  { %17 = vsyncpa [#allocation9], 0 }
   0x5   :  { %18 = vsyncpa [#allocation7], 0 }
   0x6   :  { %19 = vsyncpa [#allocation13], 0  ;;  %s2406_s29 = smov [#allocation8]  }
   0x7   :  { %s35_s30 = sshll.u32 %s2406_s29, 4  ;;  %s36_s30 = int_to_ptr.vmem [resolvable:$true] %s35_s30 }
   0x8   :  { %s2306_s9 = scalar_lea.vmem %s36_s30, 8192  ;;  %p2311_p1 = scmp.lt.s32.totalorder %s36_s30, %s36_s30 }
   0x9   :  { %p2307_p0 = scmp.ne.s32.totalorder %s36_s30, %s2306_s9  ;;  %p2312_p2 = scmp.lt.s32.totalorder %s2306_s9, %s2306_s9 }
   0xb   :  { %p2313_p3 = por %p2312_p2, %p2311_p1 }
   0xd   :  { %p2314_p4 = pnand %p2313_p3, %p2307_p0 }
   0xf   :  { %2317 = shalt.err (!%p2314_p4)
}
  0x10   :  { %s2407_s10 = smov 512   ;;  %s2408_s11 = smov 32  }
  0x11   :  { %41 = dma.hbm_to_vmem [thread:$0]  %s3326_s1, 8192, %s36_s30, [#allocation9], %s2407_s10, %s2407_s10, %s2408_s11  }
  0x12   :  { %s2409_s5 = smov [#allocation5]   ;;  %s2410_s15 = smov [#allocation10]  }
  0x13   :  { %s26_s14 = sshll.u32 %s2409_s5, 4  ;;  %s47_s16 = sshll.u32 %s2410_s15, 4  ;;  %s27_s14 = int_to_ptr.vmem [resolvable:$true] %s26_s14  ;;  %s48_s16 = int_to_ptr.vmem [resolvable:$true] %s47_s16 }
  0x14   :  { %s2326_s17 = scalar_lea.vmem %s27_s14, 128  ;;  %p2331_p6 = scmp.lt.s32.totalorder %s27_s14, %s27_s14 }
  0x15   :  { %p2327_p5 = scmp.ne.s32.totalorder %s27_s14, %s2326_s17  ;;  %p2332_p7 = scmp.lt.s32.totalorder %s2326_s17, %s2326_s17 }
  0x17   :  { %p2333_p8 = por %p2332_p7, %p2331_p6 }
  0x19   :  { %p2334_p9 = pnand %p2333_p8, %p2327_p5 }
  0x1b   :  { %2337 = shalt.err (!%p2334_p9)
}
  0x1c   :  { %29 = dma.hbm_to_vmem [thread:$0]  %s3325_s0, 128, %s27_s14, [#allocation6]  }
  0x1d   :  { %s2346_s20 = scalar_lea.vmem %s48_s16, 8192  ;;  %p2351_p11 = scmp.lt.s32.totalorder %s48_s16, %s48_s16 }
  0x1e   :  { %p2347_p10 = scmp.ne.s32.totalorder %s48_s16, %s2346_s20  ;;  %p2352_p12 = scmp.lt.s32.totalorder %s2346_s20, %s2346_s20 }
  0x20   :  { %p2353_p13 = por %p2352_p12, %p2351_p11 }
  0x22   :  { %p2354_p0 = pnand %p2353_p13, %p2347_p10 }
  0x24   :  { %2357 = shalt.err (!%p2354_p0)
}
  0x25   :  { %53 = dma.hbm_to_vmem [thread:$0]  %s3327_s2, 8192, %s48_s16, [#allocation9], %s2407_s10, %s2407_s10, %s2408_s11  }
  0x26   :  { %2398 = dma.done.wait [#allocation6], 128  }
  0x27   :  { %2399 = vsyncadd [#allocation6], 4294967168 }
  0x28   :  { %2400 = dma.done.wait [#allocation9], 16384  }
  0x29   :  { %2401 = vsyncadd [#allocation9], 4294950912  ;;  %v3334_v1 = vmov 0.0   ;;  %v132_v2 = vld [vmem:[#allocation8 + $0x1e8] sm:$0xff]  ;;  %v134_v3 = vld [vmem:[#allocation8 + $0x1f8] sm:$0xff]  ;;  %s2413_s23 = smov [#allocation11]  }
  0x2a   :  { %221 = vmatprep.mubr.f32.mxu0 %v3334_v1  ;;  %292 = vmatprep.mubr.f32.mxu1 %v3334_v1  ;;  %v131_v4 = vld [vmem:[#allocation8 + $0x1e0] sm:$0xff]  ;;  %v133_v5 = vld [vmem:[#allocation8 + $0x1f0] sm:$0xff]  ;;  %v128_v6 = vld [vmem:[#allocation8 + $0x1c8] sm:$0xff]  ;;  %s2045_s24 = sshll.u32 %s2413_s23, 4  ;;  %s2414_s25 = smov [#allocation12]   ;;  %s2046_s24 = int_to_ptr.vmem [resolvable:$true] %s2045_s24 }
  0x2b   :  { %157 = vmatprep.subr.mxu0 %v132_v2  ;;  %228 = vmatprep.subr.mxu1 %v134_v3  ;;  %v130_v7 = vld [vmem:[#allocation8 + $0x1d8] sm:$0xff]  ;;  %v127_v8 = vld [vmem:[#allocation8 + $0x1c0] sm:$0xff]  ;;  %v129_v9 = vld [vmem:[#allocation8 + $0x1d0] sm:$0xff]  ;;  %s2055_s26 = sshll.u32 %s2414_s25, 4  ;;  %s2358_s27 = scalar_lea.vmem %s2046_s24, 16  ;;  %s2056_s26 = int_to_ptr.vmem [resolvable:$true] %s2055_s26 }
  0x2c   :  { %158 = vmatpush1.msra.mxu0 %v131_v4  ;;  %229 = vmatpush1.msra.mxu1 %v133_v5  ;;  %v124_v10 = vld [vmem:[#allocation8 + $0x1a8] sm:$0xff]  ;;  %v126_v11 = vld [vmem:[#allocation8 + $0x1b8] sm:$0xff]  ;;  %v123_v12 = vld [vmem:[#allocation8 + $0x1a0] sm:$0xff]  ;;  %p2359_p1 = scmp.ne.s32.totalorder %s2046_s24, %s2358_s27  ;;  %s2362_s28 = scalar_lea.vmem %s2046_s24, 32 }
  0x2d   :  { %159 = vmatprep.subr.mxu0 %v128_v6  ;;  %230 = vmatprep.subr.mxu1 %v130_v7  ;;  %v125_v13 = vld [vmem:[#allocation8 + $0x1b0] sm:$0xff]  ;;  %v120_v14 = vld [vmem:[#allocation8 + $0x188] sm:$0xff]  ;;  %v122_v15 = vld [vmem:[#allocation8 + $0x198] sm:$0xff]  ;;  %p2363_p2 = scmp.lt.s32.totalorder %s2046_s24, %s2046_s24  ;;  %p2364_p3 = scmp.lt.s32.totalorder %s2362_s28, %s2358_s27 }
  0x2e   :  { %160 = vmatpush1.msra.mxu0 %v127_v8  ;;  %231 = vmatpush1.msra.mxu1 %v129_v9  ;;  %v119_v16 = vld [vmem:[#allocation8 + $0x180] sm:$0xff]  ;;  %v121_v17 = vld [vmem:[#allocation8 + $0x190] sm:$0xff]  ;;  %v116_v18 = vld [vmem:[#allocation8 + $0x168] sm:$0xff] }
  0x2f   :  { %161 = vmatprep.subr.mxu0 %v124_v10  ;;  %232 = vmatprep.subr.mxu1 %v126_v11  ;;  %v118_v19 = vld [vmem:[#allocation8 + $0x178] sm:$0xff]  ;;  %v115_v20 = vld [vmem:[#allocation8 + $0x160] sm:$0xff]  ;;  %v117_v21 = vld [vmem:[#allocation8 + $0x170] sm:$0xff]  ;;  %p2365_p4 = por %p2364_p3, %p2363_p2 }
  0x30   :  { %162 = vmatpush1.msra.mxu0 %v123_v12  ;;  %233 = vmatpush1.msra.mxu1 %v125_v13  ;;  %v112_v22 = vld [vmem:[#allocation8 + $0x148] sm:$0xff]  ;;  %v114_v23 = vld [vmem:[#allocation8 + $0x158] sm:$0xff]  ;;  %v111_v24 = vld [vmem:[#allocation8 + $0x140] sm:$0xff] }
  0x31   :  { %163 = vmatprep.subr.mxu0 %v120_v14  ;;  %234 = vmatprep.subr.mxu1 %v122_v15  ;;  %v113_v25 = vld [vmem:[#allocation8 + $0x150] sm:$0xff]  ;;  %v108_v26 = vld [vmem:[#allocation8 + $0x128] sm:$0xff]  ;;  %v110_v27 = vld [vmem:[#allocation8 + $0x138] sm:$0xff]  ;;  %p2366_p5 = pnand %p2365_p4, %p2359_p1 }
  0x32   :  { %164 = vmatpush1.msra.mxu0 %v119_v16  ;;  %235 = vmatpush1.msra.mxu1 %v121_v17  ;;  %v107_v28 = vld [vmem:[#allocation8 + $0x120] sm:$0xff]  ;;  %v109_v29 = vld [vmem:[#allocation8 + $0x130] sm:$0xff]  ;;  %v104_v30 = vld [vmem:[#allocation8 + $0x108] sm:$0xff] }
  0x33   :  { %165 = vmatprep.subr.mxu0 %v116_v18  ;;  %236 = vmatprep.subr.mxu1 %v118_v19  ;;  %v106_v31 = vld [vmem:[#allocation8 + $0x118] sm:$0xff]  ;;  %v103_v32 = vld [vmem:[#allocation8 + $0x100] sm:$0xff]  ;;  %v105_v33 = vld [vmem:[#allocation8 + $0x110] sm:$0xff] }
  0x34   :  { %166 = vmatpush1.msra.mxu0 %v115_v20  ;;  %237 = vmatpush1.msra.mxu1 %v117_v21  ;;  %v100_v34 = vld [vmem:[#allocation8 + $0xe8] sm:$0xff]  ;;  %v102_v35 = vld [vmem:[#allocation8 + $0xf8] sm:$0xff]  ;;  %v99_v36 = vld [vmem:[#allocation8 + $0xe0] sm:$0xff] }
  0x35   :  { %167 = vmatprep.subr.mxu0 %v112_v22  ;;  %238 = vmatprep.subr.mxu1 %v114_v23  ;;  %v101_v37 = vld [vmem:[#allocation8 + $0xf0] sm:$0xff]  ;;  %v96_v38 = vld [vmem:[#allocation8 + $0xc8] sm:$0xff]  ;;  %v98_v39 = vld [vmem:[#allocation8 + $0xd8] sm:$0xff] }
  0x36   :  { %168 = vmatpush1.msra.mxu0 %v111_v24  ;;  %239 = vmatpush1.msra.mxu1 %v113_v25  ;;  %v95_v40 = vld [vmem:[#allocation8 + $0xc0] sm:$0xff]  ;;  %v97_v41 = vld [vmem:[#allocation8 + $0xd0] sm:$0xff]  ;;  %v92_v42 = vld [vmem:[#allocation8 + $0xa8] sm:$0xff] }
  0x37   :  { %169 = vmatprep.subr.mxu0 %v108_v26  ;;  %240 = vmatprep.subr.mxu1 %v110_v27  ;;  %v94_v43 = vld [vmem:[#allocation8 + $0xb8] sm:$0xff]  ;;  %v91_v44 = vld [vmem:[#allocation8 + $0xa0] sm:$0xff]  ;;  %v93_v45 = vld [vmem:[#allocation8 + $0xb0] sm:$0xff] }
  0x38   :  { %170 = vmatpush1.msra.mxu0 %v107_v28  ;;  %241 = vmatpush1.msra.mxu1 %v109_v29  ;;  %v88_v46 = vld [vmem:[#allocation8 + $0x88] sm:$0xff]  ;;  %v90_v47 = vld [vmem:[#allocation8 + $0x98] sm:$0xff]  ;;  %v87_v48 = vld [vmem:[#allocation8 + $0x80] sm:$0xff] }
  0x39   :  { %171 = vmatprep.subr.mxu0 %v104_v30  ;;  %242 = vmatprep.subr.mxu1 %v106_v31  ;;  %v89_v49 = vld [vmem:[#allocation8 + $0x90] sm:$0xff]  ;;  %v84_v50 = vld [vmem:[#allocation8 + $0x68] sm:$0xff]  ;;  %v86_v51 = vld [vmem:[#allocation8 + $0x78] sm:$0xff] }
  0x3a   :  { %172 = vmatpush1.msra.mxu0 %v103_v32  ;;  %243 = vmatpush1.msra.mxu1 %v105_v33  ;;  %v83_v52 = vld [vmem:[#allocation8 + $0x60] sm:$0xff]  ;;  %v85_v53 = vld [vmem:[#allocation8 + $0x70] sm:$0xff]  ;;  %v80_v54 = vld [vmem:[#allocation8 + $0x48] sm:$0xff] }
  0x3b   :  { %173 = vmatprep.subr.mxu0 %v100_v34  ;;  %244 = vmatprep.subr.mxu1 %v102_v35  ;;  %v82_v55 = vld [vmem:[#allocation8 + $0x58] sm:$0xff]  ;;  %v79_v56 = vld [vmem:[#allocation8 + $0x40] sm:$0xff]  ;;  %v81_v57 = vld [vmem:[#allocation8 + $0x50] sm:$0xff] }
  0x3c   :  { %174 = vmatpush1.msra.mxu0 %v99_v36  ;;  %245 = vmatpush1.msra.mxu1 %v101_v37  ;;  %v76_v58 = vld [vmem:[#allocation8 + $0x28] sm:$0xff]  ;;  %v78_v59 = vld [vmem:[#allocation8 + $0x38] sm:$0xff]  ;;  %v75_v61 = vld [vmem:[#allocation8 + $0x20] sm:$0xff] }
  0x3d   :  { %175 = vmatprep.subr.mxu0 %v96_v38  ;;  %246 = vmatprep.subr.mxu1 %v98_v39  ;;  %v69_v60 = vld [vmem:[#allocation5] sm:$0xff]  ;;  %v77_v62 = vld [vmem:[#allocation8 + $0x30] sm:$0xff]  ;;  %v72_v63 = vld [vmem:[#allocation8 + $0x8] sm:$0xff] }
  0x3e   :  { %176 = vmatpush1.msra.mxu0 %v95_v40  ;;  %247 = vmatpush1.msra.mxu1 %v97_v41  ;;  %v74_v0 = vld [vmem:[#allocation8 + $0x18] sm:$0xff]  ;;  %v71_v2 = vld [vmem:[#allocation8] sm:$0xff]  ;;  %v73_v3 = vld [vmem:[#allocation8 + $0x10] sm:$0xff]  ;;  %v70_v4 = vmax.f32 %v69_v60, 0.0 }
  0x3f   :  { %177 = vmatprep.subr.mxu0 %v92_v42  ;;  %248 = vmatprep.subr.mxu1 %v94_v43  ;;  %v2474_v5 = vld [vmem:[#allocation10 + $0x1e8] sm:$0xff]  ;;  %v2476_v6 = vld [vmem:[#allocation10 + $0x1f8] sm:$0xff]  ;;  %v2478_v7 = vld [vmem:[#allocation10 + $0x1e0] sm:$0xff] }
  0x40   :  { %178 = vmatpush1.msra.mxu0 %v91_v44  ;;  %249 = vmatpush1.msra.mxu1 %v93_v45  ;;  %3425 = vst [vmem:[#allocation18_spill] sm:$0xff] %v2474_v5  ;;  %3426 = vst [vmem:[#allocation19_spill] sm:$0xff] %v2476_v6  ;;  %v2480_v8 = vld [vmem:[#allocation10 + $0x1f0] sm:$0xff]  ;;  %v2482_v9 = vld [vmem:[#allocation10 + $0x1c8] sm:$0xff] }
  0x41   :  { %179 = vmatprep.subr.mxu0 %v88_v46  ;;  %250 = vmatprep.subr.mxu1 %v90_v47  ;;  %v2484_v10 = vld [vmem:[#allocation10 + $0x1d8] sm:$0xff]  ;;  %v2488_v11 = vld [vmem:[#allocation10 + $0x1c0] sm:$0xff]  ;;  %v2490_v12 = vld [vmem:[#allocation10 + $0x1d0] sm:$0xff] }
  0x42   :  { %180 = vmatpush1.msra.mxu0 %v87_v48  ;;  %251 = vmatpush1.msra.mxu1 %v89_v49  ;;  %v2494_v13 = vld [vmem:[#allocation10 + $0x1a8] sm:$0xff]  ;;  %v2496_v14 = vld [vmem:[#allocation10 + $0x1b8] sm:$0xff]  ;;  %v2500_v15 = vld [vmem:[#allocation10 + $0x1a0] sm:$0xff] }
  0x43   :  { %181 = vmatprep.subr.mxu0 %v84_v50  ;;  %252 = vmatprep.subr.mxu1 %v86_v51  ;;  %v2502_v16 = vld [vmem:[#allocation10 + $0x1b0] sm:$0xff]  ;;  %v2506_v17 = vld [vmem:[#allocation10 + $0x188] sm:$0xff]  ;;  %v2508_v18 = vld [vmem:[#allocation10 + $0x198] sm:$0xff] }
  0x44   :  { %182 = vmatpush1.msra.mxu0 %v83_v52  ;;  %253 = vmatpush1.msra.mxu1 %v85_v53  ;;  %v2512_v19 = vld [vmem:[#allocation10 + $0x180] sm:$0xff]  ;;  %v2514_v20 = vld [vmem:[#allocation10 + $0x190] sm:$0xff]  ;;  %v2518_v21 = vld [vmem:[#allocation10 + $0x168] sm:$0xff] }
  0x45   :  { %183 = vmatprep.subr.mxu0 %v80_v54  ;;  %254 = vmatprep.subr.mxu1 %v82_v55  ;;  %v2520_v22 = vld [vmem:[#allocation10 + $0x178] sm:$0xff]  ;;  %v2524_v23 = vld [vmem:[#allocation10 + $0x160] sm:$0xff]  ;;  %v2526_v24 = vld [vmem:[#allocation10 + $0x170] sm:$0xff] }
  0x46   :  { %184 = vmatpush1.msra.mxu0 %v79_v56  ;;  %255 = vmatpush1.msra.mxu1 %v81_v57  ;;  %v2530_v25 = vld [vmem:[#allocation10 + $0x148] sm:$0xff]  ;;  %v2532_v26 = vld [vmem:[#allocation10 + $0x158] sm:$0xff]  ;;  %v2536_v27 = vld [vmem:[#allocation10 + $0x140] sm:$0xff] }
  0x47   :  { %185 = vmatprep.subr.mxu0 %v76_v58  ;;  %256 = vmatprep.subr.mxu1 %v78_v59  ;;  %v2538_v28 = vld [vmem:[#allocation10 + $0x150] sm:$0xff]  ;;  %v2542_v29 = vld [vmem:[#allocation10 + $0x128] sm:$0xff]  ;;  %v2544_v30 = vld [vmem:[#allocation10 + $0x138] sm:$0xff] }
  0x48   :  { %186 = vmatpush1.msra.mxu0 %v75_v61  ;;  %257 = vmatpush1.msra.mxu1 %v77_v62  ;;  %v2548_v31 = vld [vmem:[#allocation10 + $0x120] sm:$0xff]  ;;  %v2550_v32 = vld [vmem:[#allocation10 + $0x130] sm:$0xff]  ;;  %v2554_v33 = vld [vmem:[#allocation10 + $0x108] sm:$0xff] }
  0x49   :  { %187 = vmatprep.subr.mxu0 %v72_v63  ;;  %258 = vmatprep.subr.mxu1 %v74_v0  ;;  %v2556_v34 = vld [vmem:[#allocation10 + $0x118] sm:$0xff]  ;;  %v2560_v35 = vld [vmem:[#allocation10 + $0x100] sm:$0xff]  ;;  %v2562_v36 = vld [vmem:[#allocation10 + $0x110] sm:$0xff] }
  0x4a   :  { %188 = vmatpush1.msra.mxu0 %v71_v2  ;;  %259 = vmatpush1.msra.mxu1 %v73_v3  ;;  %v2566_v37 = vld [vmem:[#allocation10 + $0xe8] sm:$0xff]  ;;  %v2568_v38 = vld [vmem:[#allocation10 + $0xf8] sm:$0xff]  ;;  %v2572_v39 = vld [vmem:[#allocation10 + $0xe0] sm:$0xff] }
  0x4b   :  { %222 = vmatmul.mubr.f32.vlgmr.msra.gmra.mxu0 %v70_v4  ;;  %293 = vmatmul.mubr.f32.vlgmr.msra.gmra.mxu1 %v70_v4  ;;  %v2574_v40 = vld [vmem:[#allocation10 + $0xf0] sm:$0xff]  ;;  %v2578_v41 = vld [vmem:[#allocation10 + $0xc8] sm:$0xff]  ;;  %v2580_v42 = vld [vmem:[#allocation10 + $0xd8] sm:$0xff] }
  0x4c   :  { %368 = vmatprep.subr.mxu0 %v2474_v5  ;;  %439 = vmatprep.subr.mxu1 %v2476_v6  ;;  %v2584_v43 = vld [vmem:[#allocation10 + $0xc0] sm:$0xff]  ;;  %v2586_v44 = vld [vmem:[#allocation10 + $0xd0] sm:$0xff]  ;;  %v2590_v45 = vld [vmem:[#allocation10 + $0xa8] sm:$0xff] }
  0x4d   :  { %369 = vmatpush1.msra.mxu0 %v2478_v7  ;;  %440 = vmatpush1.msra.mxu1 %v2480_v8  ;;  %v2592_v46 = vld [vmem:[#allocation10 + $0xb8] sm:$0xff]  ;;  %v2596_v47 = vld [vmem:[#allocation10 + $0xa0] sm:$0xff]  ;;  %v2598_v48 = vld [vmem:[#allocation10 + $0xb0] sm:$0xff] }
  0x4e   :  { %370 = vmatprep.subr.mxu0 %v2482_v9  ;;  %441 = vmatprep.subr.mxu1 %v2484_v10  ;;  %v2602_v49 = vld [vmem:[#allocation10 + $0x88] sm:$0xff]  ;;  %v2604_v50 = vld [vmem:[#allocation10 + $0x98] sm:$0xff]  ;;  %v2608_v51 = vld [vmem:[#allocation10 + $0x80] sm:$0xff] }
  0x4f   :  { %371 = vmatpush1.msra.mxu0 %v2488_v11  ;;  %442 = vmatpush1.msra.mxu1 %v2490_v12  ;;  %3427 = vst [vmem:[#allocation20_spill] sm:$0xff] %v2602_v49  ;;  %3428 = vst [vmem:[#allocation21_spill] sm:$0xff] %v2604_v50  ;;  %v2610_v52 = vld [vmem:[#allocation10 + $0x90] sm:$0xff]  ;;  %v2614_v53 = vld [vmem:[#allocation10 + $0x68] sm:$0xff] }
  0x50   :  { %372 = vmatprep.subr.mxu0 %v2494_v13  ;;  %443 = vmatprep.subr.mxu1 %v2496_v14  ;;  %3429 = vst [vmem:[#allocation22_spill] sm:$0xff] %v2608_v51  ;;  %3430 = vst [vmem:[#allocation23_spill] sm:$0xff] %v2610_v52  ;;  %v2616_v54 = vld [vmem:[#allocation10 + $0x78] sm:$0xff]  ;;  %v2620_v55 = vld [vmem:[#allocation10 + $0x60] sm:$0xff] }
  0x51   :  { %373 = vmatpush1.msra.mxu0 %v2500_v15  ;;  %444 = vmatpush1.msra.mxu1 %v2502_v16  ;;  %3431 = vst [vmem:[#allocation24_spill] sm:$0xff] %v2614_v53  ;;  %3432 = vst [vmem:[#allocation25_spill] sm:$0xff] %v2616_v54  ;;  %v2622_v56 = vld [vmem:[#allocation10 + $0x70] sm:$0xff]  ;;  %v2626_v57 = vld [vmem:[#allocation10 + $0x48] sm:$0xff] }
  0x52   :  { %374 = vmatprep.subr.mxu0 %v2506_v17  ;;  %445 = vmatprep.subr.mxu1 %v2508_v18  ;;  %3433 = vst [vmem:[#allocation26_spill] sm:$0xff] %v2620_v55  ;;  %3434 = vst [vmem:[#allocation27_spill] sm:$0xff] %v2622_v56  ;;  %v2628_v58 = vld [vmem:[#allocation10 + $0x58] sm:$0xff]  ;;  %v2632_v59 = vld [vmem:[#allocation10 + $0x40] sm:$0xff] }
  0x53   :  { %375 = vmatpush1.msra.mxu0 %v2512_v19  ;;  %446 = vmatpush1.msra.mxu1 %v2514_v20  ;;  %3435 = vst [vmem:[#allocation28_spill] sm:$0xff] %v2626_v57  ;;  %3436 = vst [vmem:[#allocation29_spill] sm:$0xff] %v2628_v58  ;;  %v2634_v60 = vld [vmem:[#allocation10 + $0x50] sm:$0xff]  ;;  %v2638_v61 = vld [vmem:[#allocation10 + $0x28] sm:$0xff] }
  0x54   :  { %376 = vmatprep.subr.mxu0 %v2518_v21  ;;  %447 = vmatprep.subr.mxu1 %v2520_v22  ;;  %3437 = vst [vmem:[#allocation30_spill] sm:$0xff] %v2632_v59  ;;  %3438 = vst [vmem:[#allocation31_spill] sm:$0xff] %v2634_v60  ;;  %v2640_v62 = vld [vmem:[#allocation10 + $0x38] sm:$0xff]  ;;  %v2644_v63 = vld [vmem:[#allocation10 + $0x20] sm:$0xff] }
  0x55   :  { %377 = vmatpush1.msra.mxu0 %v2524_v23  ;;  %448 = vmatpush1.msra.mxu1 %v2526_v24  ;;  %3439 = vst [vmem:[#allocation32_spill] sm:$0xff] %v2638_v61  ;;  %3440 = vst [vmem:[#allocation33_spill] sm:$0xff] %v2640_v62  ;;  %v2646_v0 = vld [vmem:[#allocation10 + $0x30] sm:$0xff]  ;;  %v2650_v2 = vld [vmem:[#allocation10 + $0x8] sm:$0xff] }
  0x56   :  { %378 = vmatprep.subr.mxu0 %v2530_v25  ;;  %449 = vmatprep.subr.mxu1 %v2532_v26  ;;  %3441 = vst [vmem:[#allocation34_spill] sm:$0xff] %v2644_v63  ;;  %3442 = vst [vmem:[#allocation35_spill] sm:$0xff] %v2646_v0  ;;  %v2652_v3 = vld [vmem:[#allocation10 + $0x18] sm:$0xff]  ;;  %v2656_v4 = vld [vmem:[#allocation10] sm:$0xff] }
  0x57   :  { %379 = vmatpush1.msra.mxu0 %v2536_v27  ;;  %450 = vmatpush1.msra.mxu1 %v2538_v28  ;;  %3443 = vst [vmem:[#allocation36_spill] sm:$0xff] %v2650_v2  ;;  %3444 = vst [vmem:[#allocation37_spill] sm:$0xff] %v2652_v3  ;;  %v2660_v1 = vld [vmem:[#allocation10 + $0x10] sm:$0xff] }
  0x58   :  { %380 = vmatprep.subr.mxu0 %v2542_v29  ;;  %451 = vmatprep.subr.mxu1 %v2544_v30  ;;  %3445 = vst [vmem:[#allocation38_spill] sm:$0xff] %v2656_v4  ;;  %3446 = vst [vmem:[#allocation39_spill] sm:$0xff] %v2660_v1 }
  0x59   :  { %381 = vmatpush1.msra.mxu0 %v2548_v31  ;;  %452 = vmatpush1.msra.mxu1 %v2550_v32 }
  0x5a   :  { %382 = vmatprep.subr.mxu0 %v2554_v33  ;;  %453 = vmatprep.subr.mxu1 %v2556_v34 }
  0x5b   :  { %383 = vmatpush1.msra.mxu0 %v2560_v35  ;;  %454 = vmatpush1.msra.mxu1 %v2562_v36 }
  0x5c   :  { %384 = vmatprep.subr.mxu0 %v2566_v37  ;;  %455 = vmatprep.subr.mxu1 %v2568_v38 }
  0x5d   :  { %385 = vmatpush1.msra.mxu0 %v2572_v39  ;;  %456 = vmatpush1.msra.mxu1 %v2574_v40 }
  0x5e   :  { %386 = vmatprep.subr.mxu0 %v2578_v41  ;;  %457 = vmatprep.subr.mxu1 %v2580_v42 }
  0x5f   :  { %387 = vmatpush1.msra.mxu0 %v2584_v43  ;;  %458 = vmatpush1.msra.mxu1 %v2586_v44 }
  0x60   :  { %388 = vmatprep.subr.mxu0 %v2590_v45  ;;  %459 = vmatprep.subr.mxu1 %v2592_v46 }
  0x61   :  { %389 = vmatpush1.msra.mxu0 %v2596_v47  ;;  %460 = vmatpush1.msra.mxu1 %v2598_v48 }
  0x62   :  { %390 = vmatprep.subr.mxu0 %v2602_v49  ;;  %461 = vmatprep.subr.mxu1 %v2604_v50 }
  0x63   :  { %391 = vmatpush1.msra.mxu0 %v2608_v51  ;;  %462 = vmatpush1.msra.mxu1 %v2610_v52 }
  0x64   :  { %392 = vmatprep.subr.mxu0 %v2614_v53  ;;  %463 = vmatprep.subr.mxu1 %v2616_v54 }
  0x65   :  { %393 = vmatpush1.msra.mxu0 %v2620_v55  ;;  %464 = vmatpush1.msra.mxu1 %v2622_v56 }
  0x66   :  { %394 = vmatprep.subr.mxu0 %v2626_v57  ;;  %465 = vmatprep.subr.mxu1 %v2628_v58 }
  0x67   :  { %395 = vmatpush1.msra.mxu0 %v2632_v59  ;;  %466 = vmatpush1.msra.mxu1 %v2634_v60  ;;  %v3447_v60 = vmov 0.0  }
  0x68   :  { %396 = vmatprep.subr.mxu0 %v2638_v61  ;;  %467 = vmatprep.subr.mxu1 %v2640_v62 }
  0x69   :  { %397 = vmatpush1.msra.mxu0 %v2644_v63  ;;  %468 = vmatpush1.msra.mxu1 %v2646_v0 }
  0x6a   :  { %398 = vmatprep.subr.mxu0 %v2650_v2  ;;  %469 = vmatprep.subr.mxu1 %v2652_v3 }
  0x6b   :  { %399 = vmatpush1.msra.mxu0 %v2656_v4  ;;  %432 = vmatprep.mubr.f32.mxu0 %v3447_v60 }
  0x6c   :  { %470 = vmatpush1.msra.mxu1 %v2660_v1  ;;  %503 = vmatprep.mubr.f32.mxu1 %v3447_v60 }
  0x6d   :  { %433 = vmatmul.mubr.f32.vlgmr.msra.gmra.mxu0 %v3447_v60  ;;  %504 = vmatmul.mubr.f32.vlgmr.msra.gmra.mxu1 %v3447_v60 }
  0x6e   :  { %574 = vmatprep.subr.mxu0 %v2474_v5  ;;  %645 = vmatprep.subr.mxu1 %v2476_v6 }
  0x6f   :  { %575 = vmatpush1.msra.mxu0 %v2478_v7  ;;  %646 = vmatpush1.msra.mxu1 %v2480_v8 }
  0x70   :  { %576 = vmatprep.subr.mxu0 %v2482_v9  ;;  %647 = vmatprep.subr.mxu1 %v2484_v10 }
  0x71   :  { %577 = vmatpush1.msra.mxu0 %v2488_v11  ;;  %648 = vmatpush1.msra.mxu1 %v2490_v12 }
  0x72   :  { %578 = vmatprep.subr.mxu0 %v2494_v13  ;;  %649 = vmatprep.subr.mxu1 %v2496_v14 }
  0x73   :  { %579 = vmatpush1.msra.mxu0 %v2500_v15  ;;  %650 = vmatpush1.msra.mxu1 %v2502_v16 }
  0x74   :  { %580 = vmatprep.subr.mxu0 %v2506_v17  ;;  %651 = vmatprep.subr.mxu1 %v2508_v18 }
  0x75   :  { %581 = vmatpush1.msra.mxu0 %v2512_v19  ;;  %652 = vmatpush1.msra.mxu1 %v2514_v20 }
  0x76   :  { %582 = vmatprep.subr.mxu0 %v2518_v21  ;;  %653 = vmatprep.subr.mxu1 %v2520_v22 }
  0x77   :  { %583 = vmatpush1.msra.mxu0 %v2524_v23  ;;  %654 = vmatpush1.msra.mxu1 %v2526_v24 }
  0x78   :  { %584 = vmatprep.subr.mxu0 %v2530_v25  ;;  %655 = vmatprep.subr.mxu1 %v2532_v26 }
  0x79   :  { %585 = vmatpush1.msra.mxu0 %v2536_v27  ;;  %656 = vmatpush1.msra.mxu1 %v2538_v28 }
  0x7a   :  { %586 = vmatprep.subr.mxu0 %v2542_v29  ;;  %657 = vmatprep.subr.mxu1 %v2544_v30 }
  0x7b   :  { %587 = vmatpush1.msra.mxu0 %v2548_v31  ;;  %658 = vmatpush1.msra.mxu1 %v2550_v32 }
  0x7c   :  { %588 = vmatprep.subr.mxu0 %v2554_v33  ;;  %659 = vmatprep.subr.mxu1 %v2556_v34 }
  0x7d   :  { %589 = vmatpush1.msra.mxu0 %v2560_v35  ;;  %660 = vmatpush1.msra.mxu1 %v2562_v36 }
  0x7e   :  { %590 = vmatprep.subr.mxu0 %v2566_v37  ;;  %661 = vmatprep.subr.mxu1 %v2568_v38 }
  0x7f   :  { %591 = vmatpush1.msra.mxu0 %v2572_v39  ;;  %662 = vmatpush1.msra.mxu1 %v2574_v40 }
  0x80   :  { %592 = vmatprep.subr.mxu0 %v2578_v41  ;;  %663 = vmatprep.subr.mxu1 %v2580_v42 }
  0x81   :  { %593 = vmatpush1.msra.mxu0 %v2584_v43  ;;  %664 = vmatpush1.msra.mxu1 %v2586_v44 }
  0x82   :  { %594 = vmatprep.subr.mxu0 %v2590_v45  ;;  %665 = vmatprep.subr.mxu1 %v2592_v46 }
  0x83   :  { %595 = vmatpush1.msra.mxu0 %v2596_v47  ;;  %666 = vmatpush1.msra.mxu1 %v2598_v48 }
  0x84   :  { %596 = vmatprep.subr.mxu0 %v2602_v49  ;;  %667 = vmatprep.subr.mxu1 %v2604_v50  ;;  %v3448_v49 = vld [vmem:[#allocation31_spill] sm:$0xff] }
  0x85   :  { %597 = vmatpush1.msra.mxu0 %v2608_v51  ;;  %668 = vmatpush1.msra.mxu1 %v2610_v52 }
  0x86   :  { %598 = vmatprep.subr.mxu0 %v2614_v53  ;;  %669 = vmatprep.subr.mxu1 %v2616_v54  ;;  %v2412_v53 = vmov 1966171168  }
  0x87   :  { %599 = vmatpush1.msra.mxu0 %v2620_v55  ;;  %670 = vmatpush1.msra.mxu1 %v2622_v56  ;;  %v517_v52 = vunpack.c.l.s4 %v2412_v53 }
  0x88   :  { %600 = vmatprep.subr.mxu0 %v2626_v57  ;;  %671 = vmatprep.subr.mxu1 %v2628_v58 }
  0x89   :  { %601 = vmatpush1.msra.mxu0 %v2632_v59  ;;  %672 = vmatpush1.msra.mxu1 %v3448_v49  ;;  %v518_v51 = vunpack.c.0.s8 %v517_v52 }
  0x8a   :  { %602 = vmatprep.subr.mxu0 %v2638_v61  ;;  %673 = vmatprep.subr.mxu1 %v2640_v62  ;;  %v137_v62 = vlaneseq }
  0x8b   :  { %603 = vmatpush1.msra.mxu0 %v2644_v63  ;;  %674 = vmatpush1.msra.mxu1 %v2646_v0 }
  0x8c   :  { %604 = vmatprep.subr.mxu0 %v2650_v2  ;;  %675 = vmatprep.subr.mxu1 %v2652_v3  ;;  %v138_v63 = vshrl.u32 %v137_v62, 7  ;;  %v135_v3 = vld [vmem:[%s3328_s3] sm:$0xf] }
  0x8d   :  { %605 = vmatpush1.msra.mxu0 %v2656_v4  ;;  %638 = vmatprep.mubr.f32.mxu0 %v3447_v60 }
  0x8e   :  { %676 = vmatpush1.msra.mxu1 %v2660_v1  ;;  %709 = vmatprep.mubr.f32.mxu1 %v3447_v60  ;;  %v139_v61 = vsub.s32 0, %v138_v63  ;;  %v147_v0 = vsub.s32 2, %v138_v63  ;;  %v143_v2 = vsub.s32 1, %v138_v63  ;;  %v151_v4 = vsub.s32 3, %v138_v63 }
  0x8f   :  { %780 = vmatprep.subr.mxu0 %v2474_v5  ;;  %851 = vmatprep.subr.mxu1 %v2476_v6 }
  0x90   :  { %v140_v49 = vrot.slane %v135_v3, %v139_v61  ;;  %v148_v59 = vrot.slane %v135_v3, %v147_v0  ;;  %v144_v58 = vrot.slane %v135_v3, %v143_v2  ;;  %v152_v1 = vrot.slane %v135_v3, %v151_v4 }
  0x91   :  { %v2741_v0 = vsub.s32 %v518_v51, %v138_v63 }
 0x10b   :  { %v223_v57 = vpop.f32.mrf.mxu0  ;;  %v294_v60 = vpop.f32.mrf.mxu1 }
 0x10c   :  { %v224_v56 = vadd.f32 %v223_v57, %v140_v49  ;;  %v295_v5 = vadd.f32 %v294_v60, %v148_v59 }
 0x10d   :  { %v225_v55 = vpop.f32.mrf.mxu0  ;;  %v296_v6 = vpop.f32.mrf.mxu1 }
 0x10e   :  { %299 = vst [vmem:[#allocation3] sm:$0xff] %v224_v56  ;;  %301 = vst [vmem:[#allocation3 + $0x10] sm:$0xff] %v295_v5  ;;  %v226_v62 = vadd.f32 %v225_v55, %v144_v58  ;;  %v297_v54 = vadd.f32 %v296_v6, %v152_v1 }
 0x110   :  { %300 = vst [vmem:[#allocation3 + $0x8] sm:$0xff] %v226_v62  ;;  %302 = vst [vmem:[#allocation3 + $0x18] sm:$0xff] %v297_v54 }
 0x117   :  { %v367_v6 = vld [vmem:[#allocation3] ss:$8 sm:$0xf] }
 0x12d   :  { %v434_v50 = vpop.f32.mrf.mxu0  ;;  %v505_v61 = vpop.f32.mrf.mxu1 }
 0x12f   :  { %v436_v2 = vpop.f32.mrf.mxu0  ;;  %v507_v3 = vpop.f32.mrf.mxu1 }
 0x130   :  { %v514_v4 = vcombine.low %v434_v50, %v436_v2  ;;  %v515_v49 = vcombine.low %v505_v61, %v507_v3 }
 0x132   :  { %v522_v57 = vrot.slane %v514_v4, %v2741_v0  ;;  %v529_v56 = vrot.slane %v515_v49, %v2741_v0 }
 0x134   :  { %v530_v5 = vcombine.low %v522_v57, %v529_v56 }
 0x136   :  { %v537_v1 = vrot.slane %v530_v5, %v2741_v0 }
 0x138   :  { %v539_v54 = vadd.f32 %v537_v1, %v367_v6 }
 0x13a   :  { %v2071_v55 = vmul.f32 -1.442695, %v539_v54  ;;  %v547_v53 = vrot.slane %v539_v54, 1  ;;  %v558_v51 = vrot.slane %v539_v54, 3  ;;  %v555_v60 = vrot.slane %v539_v54, 2 }
 0x13c   :  { %2106 = vpow2.f32 %v2071_v55  ;;  %v2072_v52 = vmul.f32 -1.442695, %v547_v53  ;;  %v2073_v58 = vmul.f32 -1.442695, %v558_v51  ;;  %v3449_v55 = vld [vmem:[#allocation20_spill] sm:$0xff]  ;;  %v3450_v53 = vld [vmem:[#allocation21_spill] sm:$0xff] }
 0x13d   :  { %v3452_v51 = vld [vmem:[#allocation23_spill] sm:$0xff] }
 0x13e   :  { %2108 = vpow2.f32 %v2072_v52  ;;  %v3451_v52 = vld [vmem:[#allocation22_spill] sm:$0xff] }
 0x13f   :  { %2110 = vpow2.f32 %v2073_v58  ;;  %v3453_v58 = vld [vmem:[#allocation24_spill] sm:$0xff] }
 0x149   :  { %v2107_v59 = vpop.eup %2106 }
 0x14a   :  { %v543_v50 = vadd.f32 1.0, %v2107_v59  ;;  %v3454_v59 = vld [vmem:[#allocation25_spill] sm:$0xff] }
 0x14b   :  { %v2109_v63 = vpop.eup %2108 }
 0x14c   :  { %2112 = vrcp.f32 %v543_v50  ;;  %v552_v62 = vadd.f32 1.0, %v2109_v63  ;;  %v2111_v61 = vpop.eup %2110  ;;  %v3456_v50 = vld [vmem:[#allocation27_spill] sm:$0xff]  ;;  %v3457_v63 = vld [vmem:[#allocation28_spill] sm:$0xff] }
 0x14d   :  { %2114 = vtanh.f32 %v555_v60  ;;  %v563_v49 = vadd.f32 1.0, %v2111_v61  ;;  %v3455_v60 = vld [vmem:[#allocation26_spill] sm:$0xff] }
 0x14e   :  { %2116 = vrcp.f32 %v552_v62  ;;  %v3458_v62 = vld [vmem:[#allocation29_spill] sm:$0xff]  ;;  %v3459_v61 = vld [vmem:[#allocation30_spill] sm:$0xff] }
 0x14f   :  { %2118 = vrcp.f32 %v563_v49  ;;  %v3463_v49 = vld [vmem:[#allocation34_spill] sm:$0xff] }
 0x159   :  { %v2113_v2 = vpop.eup %2112 }
 0x15a   :  { %v2115_v3 = vpop.eup %2114 }
 0x15b   :  { %v2117_v4 = vpop.eup %2116  ;;  %v567_v56 = vmul.f32 %v2115_v3, %v2113_v2  ;;  %v3460_v2 = vld [vmem:[#allocation31_spill] sm:$0xff]  ;;  %v3461_v3 = vld [vmem:[#allocation32_spill] sm:$0xff] }
 0x15c   :  { %v566_v57 = vmul.f32 0.0, %v2117_v4  ;;  %v2119_v1 = vpop.eup %2118  ;;  %v3462_v4 = vld [vmem:[#allocation33_spill] sm:$0xff] }
 0x15e   :  { %v2746_v5 = vadd.f32 %v567_v56, %v566_v57  ;;  %v3464_v57 = vld [vmem:[#allocation35_spill] sm:$0xff]  ;;  %v3465_v56 = vld [vmem:[#allocation36_spill] sm:$0xff] }
 0x160   :  { %2120 = vtanh.f32 %v2746_v5 }
 0x16d   :  { %v2121_v6 = vpop.eup %2120 }
 0x16e   :  { %v570_v54 = vmul.f32 %v2121_v6, %v2119_v1  ;;  %v3466_v1 = vld [vmem:[#allocation37_spill] sm:$0xff]  ;;  %v3467_v6 = vld [vmem:[#allocation38_spill] sm:$0xff] }
 0x170   :  { %571 = vst [vmem:[#allocation2] sm:$0x1] %v570_v54  ;;  %639 = vmatmul.mubr.f32.vlgmr.msra.gmra.mxu0 %v570_v54  ;;  %710 = vmatmul.mubr.f32.vlgmr.msra.gmra.mxu1 %v570_v54  ;;  %v3468_v54 = vmov 0.0  }
 0x171   :  { %781 = vmatpush1.msra.mxu0 %v2478_v7  ;;  %852 = vmatpush1.msra.mxu1 %v2480_v8 }
 0x172   :  { %782 = vmatprep.subr.mxu0 %v2482_v9  ;;  %853 = vmatprep.subr.mxu1 %v2484_v10 }
 0x173   :  { %783 = vmatpush1.msra.mxu0 %v2488_v11  ;;  %854 = vmatpush1.msra.mxu1 %v2490_v12 }
 0x174   :  { %784 = vmatprep.subr.mxu0 %v2494_v13  ;;  %855 = vmatprep.subr.mxu1 %v2496_v14 }
 0x175   :  { %785 = vmatpush1.msra.mxu0 %v2500_v15  ;;  %856 = vmatpush1.msra.mxu1 %v2502_v16 }
 0x176   :  { %786 = vmatprep.subr.mxu0 %v2506_v17  ;;  %857 = vmatprep.subr.mxu1 %v2508_v18 }
 0x177   :  { %787 = vmatpush1.msra.mxu0 %v2512_v19  ;;  %858 = vmatpush1.msra.mxu1 %v2514_v20 }
 0x178   :  { %788 = vmatprep.subr.mxu0 %v2518_v21  ;;  %859 = vmatprep.subr.mxu1 %v2520_v22 }
 0x179   :  { %789 = vmatpush1.msra.mxu0 %v2524_v23  ;;  %860 = vmatpush1.msra.mxu1 %v2526_v24 }
 0x17a   :  { %790 = vmatprep.subr.mxu0 %v2530_v25  ;;  %861 = vmatprep.subr.mxu1 %v2532_v26 }
 0x17b   :  { %791 = vmatpush1.msra.mxu0 %v2536_v27  ;;  %862 = vmatpush1.msra.mxu1 %v2538_v28 }
 0x17c   :  { %792 = vmatprep.subr.mxu0 %v2542_v29  ;;  %863 = vmatprep.subr.mxu1 %v2544_v30 }
 0x17d   :  { %793 = vmatpush1.msra.mxu0 %v2548_v31  ;;  %864 = vmatpush1.msra.mxu1 %v2550_v32 }
 0x17e   :  { %794 = vmatprep.subr.mxu0 %v2554_v33  ;;  %865 = vmatprep.subr.mxu1 %v2556_v34 }
 0x17f   :  { %795 = vmatpush1.msra.mxu0 %v2560_v35  ;;  %866 = vmatpush1.msra.mxu1 %v2562_v36 }
 0x180   :  { %796 = vmatprep.subr.mxu0 %v2566_v37  ;;  %867 = vmatprep.subr.mxu1 %v2568_v38 }
 0x181   :  { %797 = vmatpush1.msra.mxu0 %v2572_v39  ;;  %868 = vmatpush1.msra.mxu1 %v2574_v40 }
 0x182   :  { %798 = vmatprep.subr.mxu0 %v2578_v41  ;;  %869 = vmatprep.subr.mxu1 %v2580_v42 }
 0x183   :  { %799 = vmatpush1.msra.mxu0 %v2584_v43  ;;  %870 = vmatpush1.msra.mxu1 %v2586_v44 }
 0x184   :  { %800 = vmatprep.subr.mxu0 %v2590_v45  ;;  %871 = vmatprep.subr.mxu1 %v2592_v46 }
 0x185   :  { %801 = vmatpush1.msra.mxu0 %v2596_v47  ;;  %872 = vmatpush1.msra.mxu1 %v2598_v48 }
 0x186   :  { %802 = vmatprep.subr.mxu0 %v3449_v55  ;;  %873 = vmatprep.subr.mxu1 %v3450_v53 }
 0x187   :  { %803 = vmatpush1.msra.mxu0 %v3451_v52  ;;  %874 = vmatpush1.msra.mxu1 %v3452_v51 }
 0x188   :  { %804 = vmatprep.subr.mxu0 %v3453_v58  ;;  %875 = vmatprep.subr.mxu1 %v3454_v59 }
 0x189   :  { %805 = vmatpush1.msra.mxu0 %v3455_v60  ;;  %876 = vmatpush1.msra.mxu1 %v3456_v50 }
 0x18a   :  { %806 = vmatprep.subr.mxu0 %v3457_v63  ;;  %877 = vmatprep.subr.mxu1 %v3458_v62  ;;  %v3469_v62 = vld [vmem:[#allocation39_spill] sm:$0xff] }
 0x18b   :  { %807 = vmatpush1.msra.mxu0 %v3459_v61  ;;  %878 = vmatpush1.msra.mxu1 %v3460_v2  ;;  %v3470_v2 = vld [vmem:[#allocation18_spill] sm:$0xff] }
 0x18c   :  { %808 = vmatprep.subr.mxu0 %v3461_v3  ;;  %879 = vmatprep.subr.mxu1 %v3462_v4  ;;  %v3471_v3 = vld [vmem:[#allocation19_spill] sm:$0xff] }
 0x18d   :  { %809 = vmatpush1.msra.mxu0 %v3463_v49  ;;  %880 = vmatpush1.msra.mxu1 %v3464_v57 }
 0x18e   :  { %810 = vmatprep.subr.mxu0 %v3465_v56  ;;  %881 = vmatprep.subr.mxu1 %v3466_v1 }
 0x18f   :  { %811 = vmatpush1.msra.mxu0 %v3467_v6  ;;  %844 = vmatprep.mubr.f32.mxu0 %v3468_v54 }
 0x190   :  { %882 = vmatpush1.msra.mxu1 %v3469_v62  ;;  %915 = vmatprep.mubr.f32.mxu1 %v3468_v54  ;;  %v573_v62 = vld [vmem:[#allocation3 + $0x1] ss:$8 sm:$0xf] }
 0x191   :  { %986 = vmatprep.subr.mxu0 %v3470_v2  ;;  %1057 = vmatprep.subr.mxu1 %v3471_v3 }
 0x230   :  { %v640_v4 = vpop.f32.mrf.mxu0  ;;  %v711_v49 = vpop.f32.mrf.mxu1 }
 0x232   :  { %v642_v61 = vpop.f32.mrf.mxu0  ;;  %v713_v57 = vpop.f32.mrf.mxu1 }
 0x233   :  { %v720_v63 = vcombine.low %v640_v4, %v642_v61  ;;  %v721_v56 = vcombine.low %v711_v49, %v713_v57 }
 0x235   :  { %v728_v1 = vrot.slane %v720_v63, %v2741_v0  ;;  %v735_v6 = vrot.slane %v721_v56, %v2741_v0 }
 0x237   :  { %v736_v50 = vcombine.low %v728_v1, %v735_v6  ;;  %v3475_v1 = vld [vmem:[#allocation24_spill] sm:$0xff]  ;;  %v3476_v6 = vld [vmem:[#allocation25_spill] sm:$0xff] }
 0x239   :  { %v743_v60 = vrot.slane %v736_v50, %v2741_v0 }
 0x23b   :  { %v745_v59 = vadd.f32 %v743_v60, %v573_v62 }
 0x23d   :  { %v2074_v54 = vmul.f32 -1.442695, %v745_v59  ;;  %v753_v58 = vrot.slane %v745_v59, 1  ;;  %v764_v3 = vrot.slane %v745_v59, 3  ;;  %v761_v53 = vrot.slane %v745_v59, 2 }
 0x23f   :  { %2122 = vpow2.f32 %v2074_v54  ;;  %v2075_v2 = vmul.f32 -1.442695, %v753_v58  ;;  %v2076_v51 = vmul.f32 -1.442695, %v764_v3  ;;  %v3474_v3 = vld [vmem:[#allocation23_spill] sm:$0xff]  ;;  %v3477_v54 = vld [vmem:[#allocation26_spill] sm:$0xff] }
 0x241   :  { %2124 = vpow2.f32 %v2075_v2 }
 0x242   :  { %2126 = vpow2.f32 %v2076_v51 }
 0x24c   :  { %v2123_v52 = vpop.eup %2122 }
 0x24d   :  { %v749_v61 = vadd.f32 1.0, %v2123_v52 }
 0x24e   :  { %v2125_v4 = vpop.eup %2124 }
 0x24f   :  { %2128 = vrcp.f32 %v749_v61  ;;  %v758_v63 = vadd.f32 1.0, %v2125_v4  ;;  %v2127_v49 = vpop.eup %2126  ;;  %v3478_v61 = vld [vmem:[#allocation27_spill] sm:$0xff]  ;;  %v3479_v4 = vld [vmem:[#allocation28_spill] sm:$0xff] }
 0x250   :  { %2130 = vtanh.f32 %v761_v53  ;;  %v769_v62 = vadd.f32 1.0, %v2127_v49  ;;  %v3473_v53 = vld [vmem:[#allocation22_spill] sm:$0xff] }
 0x251   :  { %2132 = vrcp.f32 %v758_v63  ;;  %v3480_v63 = vld [vmem:[#allocation29_spill] sm:$0xff]  ;;  %v3481_v49 = vld [vmem:[#allocation30_spill] sm:$0xff] }
 0x252   :  { %2134 = vrcp.f32 %v769_v62  ;;  %v3485_v62 = vld [vmem:[#allocation34_spill] sm:$0xff] }
 0x25c   :  { %v2129_v50 = vpop.eup %2128 }
 0x25d   :  { %v2131_v57 = vpop.eup %2130 }
 0x25e   :  { %v2133_v60 = vpop.eup %2132  ;;  %v773_v58 = vmul.f32 %v2131_v57, %v2129_v50  ;;  %v3482_v50 = vld [vmem:[#allocation31_spill] sm:$0xff]  ;;  %v3483_v57 = vld [vmem:[#allocation32_spill] sm:$0xff] }
 0x25f   :  { %v772_v56 = vmul.f32 %v2133_v60, %v2746_v5  ;;  %v2135_v52 = vpop.eup %2134  ;;  %v3472_v5 = vld [vmem:[#allocation21_spill] sm:$0xff] }
 0x260   :  { %v3484_v60 = vld [vmem:[#allocation33_spill] sm:$0xff] }
 0x261   :  { %v2819_v2 = vadd.f32 %v773_v58, %v772_v56  ;;  %v3486_v56 = vld [vmem:[#allocation35_spill] sm:$0xff]  ;;  %v3487_v58 = vld [vmem:[#allocation36_spill] sm:$0xff] }
 0x263   :  { %2136 = vtanh.f32 %v2819_v2 }
 0x270   :  { %v2137_v59 = vpop.eup %2136 }
 0x271   :  { %v776_v51 = vmul.f32 %v2137_v59, %v2135_v52  ;;  %v3488_v52 = vld [vmem:[#allocation37_spill] sm:$0xff]  ;;  %v3489_v59 = vld [vmem:[#allocation38_spill] sm:$0xff] }
 0x273   :  { %777 = vst [vmem:[#allocation2 + $0x1] sm:$0x1] %v776_v51  ;;  %845 = vmatmul.mubr.f32.vlgmr.msra.gmra.mxu0 %v776_v51  ;;  %916 = vmatmul.mubr.f32.vlgmr.msra.gmra.mxu1 %v776_v51  ;;  %v3490_v51 = vmov 0.0  }
 0x274   :  { %987 = vmatpush1.msra.mxu0 %v2478_v7  ;;  %1058 = vmatpush1.msra.mxu1 %v2480_v8 }
 0x275   :  { %988 = vmatprep.subr.mxu0 %v2482_v9  ;;  %1059 = vmatprep.subr.mxu1 %v2484_v10 }
 0x276   :  { %989 = vmatpush1.msra.mxu0 %v2488_v11  ;;  %1060 = vmatpush1.msra.mxu1 %v2490_v12 }
 0x277   :  { %990 = vmatprep.subr.mxu0 %v2494_v13  ;;  %1061 = vmatprep.subr.mxu1 %v2496_v14 }
 0x278   :  { %991 = vmatpush1.msra.mxu0 %v2500_v15  ;;  %1062 = vmatpush1.msra.mxu1 %v2502_v16 }
 0x279   :  { %992 = vmatprep.subr.mxu0 %v2506_v17  ;;  %1063 = vmatprep.subr.mxu1 %v2508_v18 }
 0x27a   :  { %993 = vmatpush1.msra.mxu0 %v2512_v19  ;;  %1064 = vmatpush1.msra.mxu1 %v2514_v20 }
 0x27b   :  { %994 = vmatprep.subr.mxu0 %v2518_v21  ;;  %1065 = vmatprep.subr.mxu1 %v2520_v22 }
 0x27c   :  { %995 = vmatpush1.msra.mxu0 %v2524_v23  ;;  %1066 = vmatpush1.msra.mxu1 %v2526_v24 }
 0x27d   :  { %996 = vmatprep.subr.mxu0 %v2530_v25  ;;  %1067 = vmatprep.subr.mxu1 %v2532_v26 }
 0x27e   :  { %997 = vmatpush1.msra.mxu0 %v2536_v27  ;;  %1068 = vmatpush1.msra.mxu1 %v2538_v28 }
 0x27f   :  { %998 = vmatprep.subr.mxu0 %v2542_v29  ;;  %1069 = vmatprep.subr.mxu1 %v2544_v30 }
 0x280   :  { %999 = vmatpush1.msra.mxu0 %v2548_v31  ;;  %1070 = vmatpush1.msra.mxu1 %v2550_v32 }
 0x281   :  { %1000 = vmatprep.subr.mxu0 %v2554_v33  ;;  %1071 = vmatprep.subr.mxu1 %v2556_v34 }
 0x282   :  { %1001 = vmatpush1.msra.mxu0 %v2560_v35  ;;  %1072 = vmatpush1.msra.mxu1 %v2562_v36 }
 0x283   :  { %1002 = vmatprep.subr.mxu0 %v2566_v37  ;;  %1073 = vmatprep.subr.mxu1 %v2568_v38 }
 0x284   :  { %1003 = vmatpush1.msra.mxu0 %v2572_v39  ;;  %1074 = vmatpush1.msra.mxu1 %v2574_v40 }
 0x285   :  { %1004 = vmatprep.subr.mxu0 %v2578_v41  ;;  %1075 = vmatprep.subr.mxu1 %v2580_v42 }
 0x286   :  { %1005 = vmatpush1.msra.mxu0 %v2584_v43  ;;  %1076 = vmatpush1.msra.mxu1 %v2586_v44 }
 0x287   :  { %1006 = vmatprep.subr.mxu0 %v2590_v45  ;;  %1077 = vmatprep.subr.mxu1 %v2592_v46 }
 0x288   :  { %1007 = vmatpush1.msra.mxu0 %v2596_v47  ;;  %1078 = vmatpush1.msra.mxu1 %v2598_v48 }
 0x289   :  { %1008 = vmatprep.subr.mxu0 %v3449_v55  ;;  %1079 = vmatprep.subr.mxu1 %v3472_v5 }
 0x28a   :  { %1009 = vmatpush1.msra.mxu0 %v3473_v53  ;;  %1080 = vmatpush1.msra.mxu1 %v3474_v3 }
 0x28b   :  { %1010 = vmatprep.subr.mxu0 %v3475_v1  ;;  %1081 = vmatprep.subr.mxu1 %v3476_v6 }
 0x28c   :  { %1011 = vmatpush1.msra.mxu0 %v3477_v54  ;;  %1082 = vmatpush1.msra.mxu1 %v3478_v61 }
 0x28d   :  { %1012 = vmatprep.subr.mxu0 %v3479_v4  ;;  %1083 = vmatprep.subr.mxu1 %v3480_v63  ;;  %v3491_v63 = vld [vmem:[#allocation39_spill] sm:$0xff] }
 0x28e   :  { %1013 = vmatpush1.msra.mxu0 %v3481_v49  ;;  %1084 = vmatpush1.msra.mxu1 %v3482_v50  ;;  %v3492_v50 = vld [vmem:[#allocation18_spill] sm:$0xff] }
 0x28f   :  { %1014 = vmatprep.subr.mxu0 %v3483_v57  ;;  %1085 = vmatprep.subr.mxu1 %v3484_v60  ;;  %v3493_v57 = vld [vmem:[#allocation19_spill] sm:$0xff] }
 0x290   :  { %1015 = vmatpush1.msra.mxu0 %v3485_v62  ;;  %1086 = vmatpush1.msra.mxu1 %v3486_v56 }
 0x291   :  { %1016 = vmatprep.subr.mxu0 %v3487_v58  ;;  %1087 = vmatprep.subr.mxu1 %v3488_v52 }
 0x292   :  { %1017 = vmatpush1.msra.mxu0 %v3489_v59  ;;  %1050 = vmatprep.mubr.f32.mxu0 %v3490_v51 }
 0x293   :  { %1088 = vmatpush1.msra.mxu1 %v3491_v63  ;;  %1121 = vmatprep.mubr.f32.mxu1 %v3490_v51  ;;  %v779_v63 = vld [vmem:[#allocation3 + $0x2] ss:$8 sm:$0xf] }
 0x294   :  { %1192 = vmatprep.subr.mxu0 %v3492_v50  ;;  %1263 = vmatprep.subr.mxu1 %v3493_v57 }
 0x333   :  { %v846_v60 = vpop.f32.mrf.mxu0  ;;  %v917_v62 = vpop.f32.mrf.mxu1 }
 0x335   :  { %v848_v49 = vpop.f32.mrf.mxu0  ;;  %v919_v56 = vpop.f32.mrf.mxu1 }
 0x336   :  { %v926_v4 = vcombine.low %v846_v60, %v848_v49  ;;  %v927_v58 = vcombine.low %v917_v62, %v919_v56 }
 0x338   :  { %v934_v52 = vrot.slane %v926_v4, %v2741_v0  ;;  %v941_v59 = vrot.slane %v927_v58, %v2741_v0 }
 0x33a   :  { %v942_v61 = vcombine.low %v934_v52, %v941_v59 }
 0x33c   :  { %v949_v54 = vrot.slane %v942_v61, %v2741_v0 }
 0x33e   :  { %v951_v6 = vadd.f32 %v949_v54, %v779_v63 }
 0x340   :  { %v2077_v51 = vmul.f32 -1.442695, %v951_v6  ;;  %v959_v1 = vrot.slane %v951_v6, 1  ;;  %v970_v57 = vrot.slane %v951_v6, 3  ;;  %v967_v5 = vrot.slane %v951_v6, 2 }
 0x342   :  { %2138 = vpow2.f32 %v2077_v51  ;;  %v2078_v50 = vmul.f32 -1.442695, %v959_v1  ;;  %v2079_v3 = vmul.f32 -1.442695, %v970_v57 }
 0x344   :  { %2140 = vpow2.f32 %v2078_v50 }
 0x345   :  { %2142 = vpow2.f32 %v2079_v3 }
 0x34f   :  { %v2139_v53 = vpop.eup %2138 }
 0x350   :  { %v955_v49 = vadd.f32 1.0, %v2139_v53 }
 0x351   :  { %v2141_v60 = vpop.eup %2140 }
 0x352   :  { %2144 = vrcp.f32 %v955_v49  ;;  %v964_v4 = vadd.f32 1.0, %v2141_v60  ;;  %v2143_v62 = vpop.eup %2142 }
 0x353   :  { %2146 = vtanh.f32 %v967_v5  ;;  %v975_v63 = vadd.f32 1.0, %v2143_v62 }
 0x354   :  { %2148 = vrcp.f32 %v964_v4 }
 0x355   :  { %2150 = vrcp.f32 %v975_v63  ;;  %v2975_v63 = vld [vmem:[#allocation10 + $0x1f0] sm:$0xff] }
 0x35f   :  { %v2145_v61 = vpop.eup %2144 }
 0x360   :  { %v2147_v56 = vpop.eup %2146 }
 0x361   :  { %v2149_v54 = vpop.eup %2148  ;;  %v979_v1 = vmul.f32 %v2147_v56, %v2145_v61 }
 0x362   :  { %v978_v58 = vmul.f32 %v2149_v54, %v2819_v2  ;;  %v2151_v53 = vpop.eup %2150  ;;  %v2972_v54 = vld [vmem:[#allocation10 + $0x1e0] sm:$0xff] }
 0x364   :  { %v2892_v52 = vadd.f32 %v979_v1, %v978_v58  ;;  %v2978_v58 = vld [vmem:[#allocation10 + $0x1c8] sm:$0xff]  ;;  %v2981_v1 = vld [vmem:[#allocation10 + $0x1d8] sm:$0xff] }
 0x366   :  { %2152 = vtanh.f32 %v2892_v52 }
 0x373   :  { %v2153_v6 = vpop.eup %2152 }
 0x374   :  { %v982_v3 = vmul.f32 %v2153_v6, %v2151_v53  ;;  %v2987_v53 = vld [vmem:[#allocation10 + $0x1d0] sm:$0xff]  ;;  %v2990_v6 = vld [vmem:[#allocation10 + $0x1a8] sm:$0xff] }
 0x376   :  { %983 = vst [vmem:[#allocation2 + $0x2] sm:$0x1] %v982_v3  ;;  %1051 = vmatmul.mubr.f32.vlgmr.msra.gmra.mxu0 %v982_v3  ;;  %1122 = vmatmul.mubr.f32.vlgmr.msra.gmra.mxu1 %v982_v3  ;;  %v2993_v3 = vld [vmem:[#allocation10 + $0x1b8] sm:$0xff] }
 0x377   :  { %1193 = vmatpush1.msra.mxu0 %v2478_v7  ;;  %1264 = vmatpush1.msra.mxu1 %v2480_v8  ;;  %v3494_v7 = vld [vmem:[#allocation21_spill] sm:$0xff]  ;;  %v3495_v8 = vld [vmem:[#allocation22_spill] sm:$0xff] }
 0x378   :  { %1194 = vmatprep.subr.mxu0 %v2482_v9  ;;  %1265 = vmatprep.subr.mxu1 %v2484_v10  ;;  %v3496_v9 = vld [vmem:[#allocation23_spill] sm:$0xff]  ;;  %v3497_v10 = vld [vmem:[#allocation24_spill] sm:$0xff] }
 0x379   :  { %1195 = vmatpush1.msra.mxu0 %v2488_v11  ;;  %1266 = vmatpush1.msra.mxu1 %v2490_v12  ;;  %v3498_v11 = vld [vmem:[#allocation25_spill] sm:$0xff]  ;;  %v3499_v12 = vld [vmem:[#allocation26_spill] sm:$0xff] }
 0x37a   :  { %1196 = vmatprep.subr.mxu0 %v2494_v13  ;;  %1267 = vmatprep.subr.mxu1 %v2496_v14  ;;  %v3500_v13 = vld [vmem:[#allocation27_spill] sm:$0xff]  ;;  %v3501_v14 = vld [vmem:[#allocation28_spill] sm:$0xff] }
 0x37b   :  { %1197 = vmatpush1.msra.mxu0 %v2500_v15  ;;  %1268 = vmatpush1.msra.mxu1 %v2502_v16  ;;  %v3502_v15 = vld [vmem:[#allocation29_spill] sm:$0xff]  ;;  %v3503_v16 = vld [vmem:[#allocation30_spill] sm:$0xff] }
 0x37c   :  { %1198 = vmatprep.subr.mxu0 %v2506_v17  ;;  %1269 = vmatprep.subr.mxu1 %v2508_v18  ;;  %v3504_v17 = vld [vmem:[#allocation31_spill] sm:$0xff]  ;;  %v3505_v18 = vld [vmem:[#allocation32_spill] sm:$0xff] }
 0x37d   :  { %1199 = vmatpush1.msra.mxu0 %v2512_v19  ;;  %1270 = vmatpush1.msra.mxu1 %v2514_v20  ;;  %v3506_v19 = vld [vmem:[#allocation33_spill] sm:$0xff]  ;;  %v3507_v20 = vld [vmem:[#allocation34_spill] sm:$0xff] }
 0x37e   :  { %1200 = vmatprep.subr.mxu0 %v2518_v21  ;;  %1271 = vmatprep.subr.mxu1 %v2520_v22  ;;  %v3508_v21 = vld [vmem:[#allocation35_spill] sm:$0xff]  ;;  %v3509_v22 = vld [vmem:[#allocation36_spill] sm:$0xff] }
 0x37f   :  { %1201 = vmatpush1.msra.mxu0 %v2524_v23  ;;  %1272 = vmatpush1.msra.mxu1 %v2526_v24  ;;  %v3510_v23 = vld [vmem:[#allocation37_spill] sm:$0xff]  ;;  %v3511_v24 = vld [vmem:[#allocation38_spill] sm:$0xff] }
 0x380   :  { %1202 = vmatprep.subr.mxu0 %v2530_v25  ;;  %1273 = vmatprep.subr.mxu1 %v2532_v26  ;;  %v3512_v25 = vmov 0.0   ;;  %v3513_v26 = vld [vmem:[#allocation39_spill] sm:$0xff] }
 0x381   :  { %1203 = vmatpush1.msra.mxu0 %v2536_v27  ;;  %1274 = vmatpush1.msra.mxu1 %v2538_v28  ;;  %v2959_v27 = vld [vmem:[#allocation10 + $0x1e8] sm:$0xff]  ;;  %v2962_v28 = vld [vmem:[#allocation10 + $0x1f8] sm:$0xff] }
 0x382   :  { %1204 = vmatprep.subr.mxu0 %v2542_v29  ;;  %1275 = vmatprep.subr.mxu1 %v2544_v30  ;;  %3514 = vst [vmem:[#allocation20_spill] sm:$0xff] %v2959_v27  ;;  %3515 = vst [vmem:[#allocation18_spill] sm:$0xff] %v2962_v28 }
 0x383   :  { %1205 = vmatpush1.msra.mxu0 %v2548_v31  ;;  %1276 = vmatpush1.msra.mxu1 %v2550_v32 }
 0x384   :  { %1206 = vmatprep.subr.mxu0 %v2554_v33  ;;  %1277 = vmatprep.subr.mxu1 %v2556_v34 }
 0x385   :  { %1207 = vmatpush1.msra.mxu0 %v2560_v35  ;;  %1278 = vmatpush1.msra.mxu1 %v2562_v36 }
 0x386   :  { %1208 = vmatprep.subr.mxu0 %v2566_v37  ;;  %1279 = vmatprep.subr.mxu1 %v2568_v38 }
 0x387   :  { %1209 = vmatpush1.msra.mxu0 %v2572_v39  ;;  %1280 = vmatpush1.msra.mxu1 %v2574_v40  ;;  %v985_v39 = vld [vmem:[#allocation3 + $0x3] ss:$8 sm:$0xf] }
 0x388   :  { %1210 = vmatprep.subr.mxu0 %v2578_v41  ;;  %1281 = vmatprep.subr.mxu1 %v2580_v42 }
 0x389   :  { %1211 = vmatpush1.msra.mxu0 %v2584_v43  ;;  %1282 = vmatpush1.msra.mxu1 %v2586_v44 }
 0x38a   :  { %1212 = vmatprep.subr.mxu0 %v2590_v45  ;;  %1283 = vmatprep.subr.mxu1 %v2592_v46 }
 0x38b   :  { %1213 = vmatpush1.msra.mxu0 %v2596_v47  ;;  %1284 = vmatpush1.msra.mxu1 %v2598_v48 }
 0x38c   :  { %1214 = vmatprep.subr.mxu0 %v3449_v55  ;;  %1285 = vmatprep.subr.mxu1 %v3494_v7  ;;  %v2996_v7 = vld [vmem:[#allocation10 + $0x1a0] sm:$0xff] }
 0x38d   :  { %1215 = vmatpush1.msra.mxu0 %v3495_v8  ;;  %1286 = vmatpush1.msra.mxu1 %v3496_v9  ;;  %v2999_v8 = vld [vmem:[#allocation10 + $0x1b0] sm:$0xff]  ;;  %v3002_v9 = vld [vmem:[#allocation10 + $0x188] sm:$0xff] }
 0x38e   :  { %1216 = vmatprep.subr.mxu0 %v3497_v10  ;;  %1287 = vmatprep.subr.mxu1 %v3498_v11  ;;  %v3005_v10 = vld [vmem:[#allocation10 + $0x198] sm:$0xff]  ;;  %v3008_v11 = vld [vmem:[#allocation10 + $0x180] sm:$0xff] }
 0x38f   :  { %1217 = vmatpush1.msra.mxu0 %v3499_v12  ;;  %1288 = vmatpush1.msra.mxu1 %v3500_v13  ;;  %v3011_v12 = vld [vmem:[#allocation10 + $0x190] sm:$0xff]  ;;  %v3014_v13 = vld [vmem:[#allocation10 + $0x168] sm:$0xff] }
 0x390   :  { %1218 = vmatprep.subr.mxu0 %v3501_v14  ;;  %1289 = vmatprep.subr.mxu1 %v3502_v15  ;;  %v3017_v14 = vld [vmem:[#allocation10 + $0x178] sm:$0xff]  ;;  %v3020_v15 = vld [vmem:[#allocation10 + $0x160] sm:$0xff] }
 0x391   :  { %1219 = vmatpush1.msra.mxu0 %v3503_v16  ;;  %1290 = vmatpush1.msra.mxu1 %v3504_v17  ;;  %v3023_v16 = vld [vmem:[#allocation10 + $0x170] sm:$0xff]  ;;  %v3026_v17 = vld [vmem:[#allocation10 + $0x148] sm:$0xff] }
 0x392   :  { %1220 = vmatprep.subr.mxu0 %v3505_v18  ;;  %1291 = vmatprep.subr.mxu1 %v3506_v19  ;;  %v3029_v18 = vld [vmem:[#allocation10 + $0x158] sm:$0xff]  ;;  %v3032_v19 = vld [vmem:[#allocation10 + $0x140] sm:$0xff] }
 0x393   :  { %1221 = vmatpush1.msra.mxu0 %v3507_v20  ;;  %1292 = vmatpush1.msra.mxu1 %v3508_v21  ;;  %v3035_v20 = vld [vmem:[#allocation10 + $0x150] sm:$0xff]  ;;  %v3038_v21 = vld [vmem:[#allocation10 + $0x128] sm:$0xff] }
 0x394   :  { %1222 = vmatprep.subr.mxu0 %v3509_v22  ;;  %1293 = vmatprep.subr.mxu1 %v3510_v23  ;;  %v3041_v22 = vld [vmem:[#allocation10 + $0x138] sm:$0xff]  ;;  %v3044_v23 = vld [vmem:[#allocation10 + $0x120] sm:$0xff] }
 0x395   :  { %1223 = vmatpush1.msra.mxu0 %v3511_v24  ;;  %1256 = vmatprep.mubr.f32.mxu0 %v3512_v25  ;;  %v3047_v24 = vld [vmem:[#allocation10 + $0x130] sm:$0xff] }
 0x396   :  { %1294 = vmatpush1.msra.mxu1 %v3513_v26  ;;  %1327 = vmatprep.mubr.f32.mxu1 %v3512_v25  ;;  %v3050_v26 = vld [vmem:[#allocation10 + $0x108] sm:$0xff] }
 0x397   :  { %1398 = vmatprep.subr.mxu0 %v2959_v27  ;;  %1469 = vmatprep.subr.mxu1 %v2962_v28 }
 0x436   :  { %v1052_v29 = vpop.f32.mrf.mxu0  ;;  %v1123_v30 = vpop.f32.mrf.mxu1 }
 0x438   :  { %v1054_v31 = vpop.f32.mrf.mxu0  ;;  %v1125_v32 = vpop.f32.mrf.mxu1 }
 0x439   :  { %v1132_v33 = vcombine.low %v1052_v29, %v1054_v31  ;;  %v1133_v34 = vcombine.low %v1123_v30, %v1125_v32  ;;  %v3053_v29 = vld [vmem:[#allocation10 + $0x118] sm:$0xff]  ;;  %v3056_v30 = vld [vmem:[#allocation10 + $0x100] sm:$0xff]  ;;  %v3059_v31 = vld [vmem:[#allocation10 + $0x110] sm:$0xff] }
 0x43a   :  { %v3062_v32 = vld [vmem:[#allocation10 + $0xe8] sm:$0xff] }
 0x43b   :  { %v1140_v35 = vrot.slane %v1132_v33, %v2741_v0  ;;  %v1147_v36 = vrot.slane %v1133_v34, %v2741_v0  ;;  %v3065_v33 = vld [vmem:[#allocation10 + $0xf8] sm:$0xff]  ;;  %v3068_v34 = vld [vmem:[#allocation10 + $0xe0] sm:$0xff] }
 0x43d   :  { %v1148_v37 = vcombine.low %v1140_v35, %v1147_v36  ;;  %v3071_v35 = vld [vmem:[#allocation10 + $0xf0] sm:$0xff]  ;;  %v3074_v36 = vld [vmem:[#allocation10 + $0xc8] sm:$0xff] }
 0x43f   :  { %v1155_v38 = vrot.slane %v1148_v37, %v2741_v0  ;;  %v3077_v37 = vld [vmem:[#allocation10 + $0xd8] sm:$0xff] }
 0x441   :  { %v1157_v40 = vadd.f32 %v1155_v38, %v985_v39  ;;  %v3080_v38 = vld [vmem:[#allocation10 + $0xc0] sm:$0xff]  ;;  %v3083_v39 = vld [vmem:[#allocation10 + $0xd0] sm:$0xff] }
 0x443   :  { %v2080_v41 = vmul.f32 -1.442695, %v1157_v40  ;;  %v1165_v42 = vrot.slane %v1157_v40, 1  ;;  %v1176_v44 = vrot.slane %v1157_v40, 3  ;;  %v1173_v47 = vrot.slane %v1157_v40, 2  ;;  %v3086_v40 = vld [vmem:[#allocation10 + $0xa8] sm:$0xff] }
 0x445   :  { %2154 = vpow2.f32 %v2080_v41  ;;  %v2081_v43 = vmul.f32 -1.442695, %v1165_v42  ;;  %v2082_v45 = vmul.f32 -1.442695, %v1176_v44  ;;  %v3089_v41 = vld [vmem:[#allocation10 + $0xb8] sm:$0xff]  ;;  %v3092_v42 = vld [vmem:[#allocation10 + $0xa0] sm:$0xff] }
 0x446   :  { %v3098_v44 = vld [vmem:[#allocation10 + $0x88] sm:$0xff] }
 0x447   :  { %2156 = vpow2.f32 %v2081_v43  ;;  %v3095_v43 = vld [vmem:[#allocation10 + $0xb0] sm:$0xff] }
 0x448   :  { %2158 = vpow2.f32 %v2082_v45  ;;  %v3101_v45 = vld [vmem:[#allocation10 + $0x98] sm:$0xff] }
 0x449   :  { %3516 = vst [vmem:[#allocation19_spill] sm:$0xff] %v3101_v45 }
 0x452   :  { %v2155_v46 = vpop.eup %2154 }
 0x453   :  { %v1161_v48 = vadd.f32 1.0, %v2155_v46  ;;  %v3104_v46 = vld [vmem:[#allocation10 + $0x80] sm:$0xff] }
 0x454   :  { %v2157_v55 = vpop.eup %2156  ;;  %3517 = vst [vmem:[#allocation21_spill] sm:$0xff] %v3104_v46 }
 0x455   :  { %2160 = vrcp.f32 %v1161_v48  ;;  %v1170_v2 = vadd.f32 1.0, %v2157_v55  ;;  %v2159_v5 = vpop.eup %2158  ;;  %v3110_v48 = vld [vmem:[#allocation10 + $0x68] sm:$0xff]  ;;  %v3113_v55 = vld [vmem:[#allocation10 + $0x78] sm:$0xff] }
 0x456   :  { %2162 = vtanh.f32 %v1173_v47  ;;  %v1181_v57 = vadd.f32 1.0, %v2159_v5  ;;  %v3107_v47 = vld [vmem:[#allocation10 + $0x90] sm:$0xff]  ;;  %3519 = vst [vmem:[#allocation23_spill] sm:$0xff] %v3110_v48  ;;  %3520 = vst [vmem:[#allocation24_spill] sm:$0xff] %v3113_v55 }
 0x457   :  { %2164 = vrcp.f32 %v1170_v2  ;;  %3518 = vst [vmem:[#allocation22_spill] sm:$0xff] %v3107_v47  ;;  %v3116_v2 = vld [vmem:[#allocation10 + $0x60] sm:$0xff]  ;;  %v3119_v5 = vld [vmem:[#allocation10 + $0x70] sm:$0xff] }
 0x458   :  { %2166 = vrcp.f32 %v1181_v57  ;;  %3521 = vst [vmem:[#allocation25_spill] sm:$0xff] %v3116_v2  ;;  %3522 = vst [vmem:[#allocation26_spill] sm:$0xff] %v3119_v5  ;;  %v3131_v57 = vld [vmem:[#allocation10 + $0x50] sm:$0xff] }
 0x459   :  { %3526 = vst [vmem:[#allocation30_spill] sm:$0xff] %v3131_v57 }
 0x462   :  { %v2161_v59 = vpop.eup %2160 }
 0x463   :  { %v2163_v51 = vpop.eup %2162 }
 0x464   :  { %v2165_v50 = vpop.eup %2164  ;;  %v1185_v60 = vmul.f32 %v2163_v51, %v2161_v59  ;;  %v3122_v59 = vld [vmem:[#allocation10 + $0x48] sm:$0xff]  ;;  %v3125_v51 = vld [vmem:[#allocation10 + $0x58] sm:$0xff] }
 0x465   :  { %v1184_v49 = vmul.f32 %v2165_v50, %v2892_v52  ;;  %v2167_v62 = vpop.eup %2166  ;;  %v2984_v52 = vld [vmem:[#allocation10 + $0x1c0] sm:$0xff]  ;;  %3523 = vst [vmem:[#allocation27_spill] sm:$0xff] %v3122_v59  ;;  %3524 = vst [vmem:[#allocation28_spill] sm:$0xff] %v3125_v51 }
 0x466   :  { %v3128_v50 = vld [vmem:[#allocation10 + $0x40] sm:$0xff] }
 0x467   :  { %v2969_v4 = vadd.f32 %v1185_v60, %v1184_v49  ;;  %3525 = vst [vmem:[#allocation29_spill] sm:$0xff] %v3128_v50  ;;  %v3134_v49 = vld [vmem:[#allocation10 + $0x28] sm:$0xff]  ;;  %v3137_v60 = vld [vmem:[#allocation10 + $0x38] sm:$0xff] }
 0x468   :  { %3527 = vst [vmem:[#allocation31_spill] sm:$0xff] %v3134_v49  ;;  %3528 = vst [vmem:[#allocation32_spill] sm:$0xff] %v3137_v60 }
 0x469   :  { %2168 = vtanh.f32 %v2969_v4 }
 0x476   :  { %v2169_v61 = vpop.eup %2168 }
 0x477   :  { %v1188_v56 = vmul.f32 %v2169_v61, %v2167_v62  ;;  %v3140_v62 = vld [vmem:[#allocation10 + $0x20] sm:$0xff]  ;;  %v3143_v61 = vld [vmem:[#allocation10 + $0x30] sm:$0xff] }
 0x478   :  { %3529 = vst [vmem:[#allocation33_spill] sm:$0xff] %v3140_v62  ;;  %3530 = vst [vmem:[#allocation34_spill] sm:$0xff] %v3143_v61 }
 0x479   :  { %1189 = vst [vmem:[#allocation2 + $0x3] sm:$0x1] %v1188_v56  ;;  %1257 = vmatmul.mubr.f32.vlgmr.msra.gmra.mxu0 %v1188_v56  ;;  %1328 = vmatmul.mubr.f32.vlgmr.msra.gmra.mxu1 %v1188_v56  ;;  %v3146_v56 = vld [vmem:[#allocation10 + $0x8] sm:$0xff] }
 0x47a   :  { %1399 = vmatpush1.msra.mxu0 %v2972_v54  ;;  %1470 = vmatpush1.msra.mxu1 %v2975_v63  ;;  %3531 = vst [vmem:[#allocation35_spill] sm:$0xff] %v3146_v56 }
 0x47b   :  { %1400 = vmatprep.subr.mxu0 %v2978_v58  ;;  %1471 = vmatprep.subr.mxu1 %v2981_v1 }
 0x47c   :  { %1401 = vmatpush1.msra.mxu0 %v2984_v52  ;;  %1472 = vmatpush1.msra.mxu1 %v2987_v53 }
 0x47d   :  { %1402 = vmatprep.subr.mxu0 %v2990_v6  ;;  %1473 = vmatprep.subr.mxu1 %v2993_v3 }
 0x47e   :  { %1403 = vmatpush1.msra.mxu0 %v2996_v7  ;;  %1474 = vmatpush1.msra.mxu1 %v2999_v8 }
 0x47f   :  { %1404 = vmatprep.subr.mxu0 %v3002_v9  ;;  %1475 = vmatprep.subr.mxu1 %v3005_v10 }
 0x480   :  { %1405 = vmatpush1.msra.mxu0 %v3008_v11  ;;  %1476 = vmatpush1.msra.mxu1 %v3011_v12 }
 0x481   :  { %1406 = vmatprep.subr.mxu0 %v3014_v13  ;;  %1477 = vmatprep.subr.mxu1 %v3017_v14 }
 0x482   :  { %1407 = vmatpush1.msra.mxu0 %v3020_v15  ;;  %1478 = vmatpush1.msra.mxu1 %v3023_v16 }
 0x483   :  { %1408 = vmatprep.subr.mxu0 %v3026_v17  ;;  %1479 = vmatprep.subr.mxu1 %v3029_v18 }
 0x484   :  { %1409 = vmatpush1.msra.mxu0 %v3032_v19  ;;  %1480 = vmatpush1.msra.mxu1 %v3035_v20 }
 0x485   :  { %1410 = vmatprep.subr.mxu0 %v3038_v21  ;;  %1481 = vmatprep.subr.mxu1 %v3041_v22 }
 0x486   :  { %1411 = vmatpush1.msra.mxu0 %v3044_v23  ;;  %1482 = vmatpush1.msra.mxu1 %v3047_v24 }
 0x487   :  { %1412 = vmatprep.subr.mxu0 %v3050_v26  ;;  %1483 = vmatprep.subr.mxu1 %v3053_v29 }
 0x488   :  { %1413 = vmatpush1.msra.mxu0 %v3056_v30  ;;  %1484 = vmatpush1.msra.mxu1 %v3059_v31 }
 0x489   :  { %1414 = vmatprep.subr.mxu0 %v3062_v32  ;;  %1485 = vmatprep.subr.mxu1 %v3065_v33 }
 0x48a   :  { %1415 = vmatpush1.msra.mxu0 %v3068_v34  ;;  %1486 = vmatpush1.msra.mxu1 %v3071_v35 }
 0x48b   :  { %1416 = vmatprep.subr.mxu0 %v3074_v36  ;;  %1487 = vmatprep.subr.mxu1 %v3077_v37 }
 0x48c   :  { %1417 = vmatpush1.msra.mxu0 %v3080_v38  ;;  %1488 = vmatpush1.msra.mxu1 %v3083_v39 }
 0x48d   :  { %1418 = vmatprep.subr.mxu0 %v3086_v40  ;;  %1489 = vmatprep.subr.mxu1 %v3089_v41 }
 0x48e   :  { %1419 = vmatpush1.msra.mxu0 %v3092_v42  ;;  %1490 = vmatpush1.msra.mxu1 %v3095_v43 }
 0x48f   :  { %1420 = vmatprep.subr.mxu0 %v3098_v44  ;;  %1491 = vmatprep.subr.mxu1 %v3101_v45 }
 0x490   :  { %1421 = vmatpush1.msra.mxu0 %v3104_v46  ;;  %1492 = vmatpush1.msra.mxu1 %v3107_v47 }
 0x491   :  { %1422 = vmatprep.subr.mxu0 %v3110_v48  ;;  %1493 = vmatprep.subr.mxu1 %v3113_v55 }
 0x492   :  { %1423 = vmatpush1.msra.mxu0 %v3116_v2  ;;  %1494 = vmatpush1.msra.mxu1 %v3119_v5 }
 0x493   :  { %1424 = vmatprep.subr.mxu0 %v3122_v59  ;;  %1495 = vmatprep.subr.mxu1 %v3125_v51 }
 0x494   :  { %1425 = vmatpush1.msra.mxu0 %v3128_v50  ;;  %1496 = vmatpush1.msra.mxu1 %v3131_v57  ;;  %v3149_v57 = vld [vmem:[#allocation10 + $0x18] sm:$0xff] }
 0x495   :  { %1426 = vmatprep.subr.mxu0 %v3134_v49  ;;  %1497 = vmatprep.subr.mxu1 %v3137_v60  ;;  %3532 = vst [vmem:[#allocation36_spill] sm:$0xff] %v3149_v57  ;;  %v3152_v49 = vld [vmem:[#allocation10] sm:$0xff]  ;;  %v3156_v60 = vld [vmem:[#allocation10 + $0x10] sm:$0xff] }
 0x496   :  { %1427 = vmatpush1.msra.mxu0 %v3140_v62  ;;  %1498 = vmatpush1.msra.mxu1 %v3143_v61  ;;  %3533 = vst [vmem:[#allocation37_spill] sm:$0xff] %v3152_v49  ;;  %3534 = vst [vmem:[#allocation38_spill] sm:$0xff] %v3156_v60 }
 0x497   :  { %1428 = vmatprep.subr.mxu0 %v3146_v56  ;;  %1499 = vmatprep.subr.mxu1 %v3149_v57 }
 0x498   :  { %1429 = vmatpush1.msra.mxu0 %v3152_v49  ;;  %1462 = vmatprep.mubr.f32.mxu0 %v3512_v25 }
 0x499   :  { %1500 = vmatpush1.msra.mxu1 %v3156_v60  ;;  %1533 = vmatprep.mubr.f32.mxu1 %v3512_v25  ;;  %v1191_v60 = vld [vmem:[#allocation3 + $0x4] ss:$8 sm:$0xf] }
 0x49a   :  { %1604 = vmatprep.subr.mxu0 %v2959_v27  ;;  %1675 = vmatprep.subr.mxu1 %v2962_v28 }
 0x539   :  { %v1258_v56 = vpop.f32.mrf.mxu0  ;;  %v1329_v61 = vpop.f32.mrf.mxu1 }
 0x53b   :  { %v1260_v62 = vpop.f32.mrf.mxu0  ;;  %v1331_v57 = vpop.f32.mrf.mxu1 }
 0x53c   :  { %v1338_v50 = vcombine.low %v1258_v56, %v1260_v62  ;;  %v1339_v51 = vcombine.low %v1329_v61, %v1331_v57  ;;  %v3539_v61 = vld [vmem:[#allocation24_spill] sm:$0xff]  ;;  %v3540_v56 = vld [vmem:[#allocation25_spill] sm:$0xff] }
 0x53e   :  { %v1346_v49 = vrot.slane %v1338_v50, %v2741_v0  ;;  %v1353_v59 = vrot.slane %v1339_v51, %v2741_v0 }
 0x540   :  { %v1354_v5 = vcombine.low %v1346_v49, %v1353_v59 }
 0x542   :  { %v1361_v2 = vrot.slane %v1354_v5, %v2741_v0 }
 0x544   :  { %v1363_v55 = vadd.f32 %v1361_v2, %v1191_v60  ;;  %v3538_v60 = vld [vmem:[#allocation23_spill] sm:$0xff] }
 0x546   :  { %v2083_v25 = vmul.f32 -1.442695, %v1363_v55  ;;  %v1371_v48 = vrot.slane %v1363_v55, 1  ;;  %v1382_v28 = vrot.slane %v1363_v55, 3  ;;  %v1379_v45 = vrot.slane %v1363_v55, 2  ;;  %v3537_v55 = vld [vmem:[#allocation22_spill] sm:$0xff] }
 0x548   :  { %2170 = vpow2.f32 %v2083_v25  ;;  %v2084_v27 = vmul.f32 -1.442695, %v1371_v48  ;;  %v2085_v47 = vmul.f32 -1.442695, %v1382_v28 }
 0x54a   :  { %2172 = vpow2.f32 %v2084_v27 }
 0x54b   :  { %2174 = vpow2.f32 %v2085_v47 }
 0x555   :  { %v2171_v46 = vpop.eup %2170 }
 0x556   :  { %v1367_v62 = vadd.f32 1.0, %v2171_v46 }
 0x557   :  { %v2173_v57 = vpop.eup %2172 }
 0x558   :  { %2176 = vrcp.f32 %v1367_v62  ;;  %v1376_v50 = vadd.f32 1.0, %v2173_v57  ;;  %v2175_v59 = vpop.eup %2174  ;;  %v3541_v62 = vld [vmem:[#allocation26_spill] sm:$0xff]  ;;  %v3542_v57 = vld [vmem:[#allocation27_spill] sm:$0xff] }
 0x559   :  { %2178 = vtanh.f32 %v1379_v45  ;;  %v1387_v49 = vadd.f32 1.0, %v2175_v59  ;;  %v3536_v45 = vld [vmem:[#allocation21_spill] sm:$0xff] }
 0x55a   :  { %2180 = vrcp.f32 %v1376_v50  ;;  %v3543_v50 = vld [vmem:[#allocation28_spill] sm:$0xff]  ;;  %v3544_v59 = vld [vmem:[#allocation29_spill] sm:$0xff] }
 0x55b   :  { %2182 = vrcp.f32 %v1387_v49  ;;  %v3548_v49 = vld [vmem:[#allocation33_spill] sm:$0xff] }
 0x565   :  { %v2177_v5 = vpop.eup %2176 }
 0x566   :  { %v2179_v51 = vpop.eup %2178 }
 0x567   :  { %v2181_v2 = vpop.eup %2180  ;;  %v1391_v48 = vmul.f32 %v2179_v51, %v2177_v5  ;;  %v3545_v5 = vld [vmem:[#allocation30_spill] sm:$0xff]  ;;  %v3546_v51 = vld [vmem:[#allocation31_spill] sm:$0xff] }
 0x568   :  { %v1390_v25 = vmul.f32 %v2181_v2, %v2969_v4  ;;  %v2183_v28 = vpop.eup %2182  ;;  %v3535_v4 = vld [vmem:[#allocation19_spill] sm:$0xff]  ;;  %v3547_v2 = vld [vmem:[#allocation32_spill] sm:$0xff] }
 0x56a   :  { %v3166_v27 = vadd.f32 %v1391_v48, %v1390_v25  ;;  %v3549_v25 = vld [vmem:[#allocation34_spill] sm:$0xff]  ;;  %v3550_v48 = vld [vmem:[#allocation35_spill] sm:$0xff] }
 0x56c   :  { %2184 = vtanh.f32 %v3166_v27 }
 0x579   :  { %v2185_v46 = vpop.eup %2184 }
 0x57a   :  { %v1394_v47 = vmul.f32 %v2185_v46, %v2183_v28  ;;  %v3551_v28 = vld [vmem:[#allocation36_spill] sm:$0xff]  ;;  %v3552_v46 = vld [vmem:[#allocation37_spill] sm:$0xff] }
 0x57c   :  { %1395 = vst [vmem:[#allocation2 + $0x4] sm:$0x1] %v1394_v47  ;;  %1463 = vmatmul.mubr.f32.vlgmr.msra.gmra.mxu0 %v1394_v47  ;;  %1534 = vmatmul.mubr.f32.vlgmr.msra.gmra.mxu1 %v1394_v47  ;;  %v3553_v47 = vmov 0.0  }
 0x57d   :  { %1605 = vmatpush1.msra.mxu0 %v2972_v54  ;;  %1676 = vmatpush1.msra.mxu1 %v2975_v63 }
 0x57e   :  { %1606 = vmatprep.subr.mxu0 %v2978_v58  ;;  %1677 = vmatprep.subr.mxu1 %v2981_v1 }
 0x57f   :  { %1607 = vmatpush1.msra.mxu0 %v2984_v52  ;;  %1678 = vmatpush1.msra.mxu1 %v2987_v53 }
 0x580   :  { %1608 = vmatprep.subr.mxu0 %v2990_v6  ;;  %1679 = vmatprep.subr.mxu1 %v2993_v3 }
 0x581   :  { %1609 = vmatpush1.msra.mxu0 %v2996_v7  ;;  %1680 = vmatpush1.msra.mxu1 %v2999_v8 }
 0x582   :  { %1610 = vmatprep.subr.mxu0 %v3002_v9  ;;  %1681 = vmatprep.subr.mxu1 %v3005_v10 }
 0x583   :  { %1611 = vmatpush1.msra.mxu0 %v3008_v11  ;;  %1682 = vmatpush1.msra.mxu1 %v3011_v12 }
 0x584   :  { %1612 = vmatprep.subr.mxu0 %v3014_v13  ;;  %1683 = vmatprep.subr.mxu1 %v3017_v14 }
 0x585   :  { %1613 = vmatpush1.msra.mxu0 %v3020_v15  ;;  %1684 = vmatpush1.msra.mxu1 %v3023_v16 }
 0x586   :  { %1614 = vmatprep.subr.mxu0 %v3026_v17  ;;  %1685 = vmatprep.subr.mxu1 %v3029_v18 }
 0x587   :  { %1615 = vmatpush1.msra.mxu0 %v3032_v19  ;;  %1686 = vmatpush1.msra.mxu1 %v3035_v20 }
 0x588   :  { %1616 = vmatprep.subr.mxu0 %v3038_v21  ;;  %1687 = vmatprep.subr.mxu1 %v3041_v22 }
 0x589   :  { %1617 = vmatpush1.msra.mxu0 %v3044_v23  ;;  %1688 = vmatpush1.msra.mxu1 %v3047_v24 }
 0x58a   :  { %1618 = vmatprep.subr.mxu0 %v3050_v26  ;;  %1689 = vmatprep.subr.mxu1 %v3053_v29 }
 0x58b   :  { %1619 = vmatpush1.msra.mxu0 %v3056_v30  ;;  %1690 = vmatpush1.msra.mxu1 %v3059_v31 }
 0x58c   :  { %1620 = vmatprep.subr.mxu0 %v3062_v32  ;;  %1691 = vmatprep.subr.mxu1 %v3065_v33 }
 0x58d   :  { %1621 = vmatpush1.msra.mxu0 %v3068_v34  ;;  %1692 = vmatpush1.msra.mxu1 %v3071_v35 }
 0x58e   :  { %1622 = vmatprep.subr.mxu0 %v3074_v36  ;;  %1693 = vmatprep.subr.mxu1 %v3077_v37 }
 0x58f   :  { %1623 = vmatpush1.msra.mxu0 %v3080_v38  ;;  %1694 = vmatpush1.msra.mxu1 %v3083_v39 }
 0x590   :  { %1624 = vmatprep.subr.mxu0 %v3086_v40  ;;  %1695 = vmatprep.subr.mxu1 %v3089_v41 }
 0x591   :  { %1625 = vmatpush1.msra.mxu0 %v3092_v42  ;;  %1696 = vmatpush1.msra.mxu1 %v3095_v43 }
 0x592   :  { %1626 = vmatprep.subr.mxu0 %v3098_v44  ;;  %1697 = vmatprep.subr.mxu1 %v3535_v4 }
 0x593   :  { %1627 = vmatpush1.msra.mxu0 %v3536_v45  ;;  %1698 = vmatpush1.msra.mxu1 %v3537_v55 }
 0x594   :  { %1628 = vmatprep.subr.mxu0 %v3538_v60  ;;  %1699 = vmatprep.subr.mxu1 %v3539_v61 }
 0x595   :  { %1629 = vmatpush1.msra.mxu0 %v3540_v56  ;;  %1700 = vmatpush1.msra.mxu1 %v3541_v62 }
 0x596   :  { %1630 = vmatprep.subr.mxu0 %v3542_v57  ;;  %1701 = vmatprep.subr.mxu1 %v3543_v50  ;;  %v3554_v50 = vld [vmem:[#allocation38_spill] sm:$0xff] }
 0x597   :  { %1631 = vmatpush1.msra.mxu0 %v3544_v59  ;;  %1702 = vmatpush1.msra.mxu1 %v3545_v5  ;;  %v3555_v5 = vld [vmem:[#allocation20_spill] sm:$0xff] }
 0x598   :  { %1632 = vmatprep.subr.mxu0 %v3546_v51  ;;  %1703 = vmatprep.subr.mxu1 %v3547_v2  ;;  %v3556_v51 = vld [vmem:[#allocation18_spill] sm:$0xff] }
 0x599   :  { %1633 = vmatpush1.msra.mxu0 %v3548_v49  ;;  %1704 = vmatpush1.msra.mxu1 %v3549_v25 }
 0x59a   :  { %1634 = vmatprep.subr.mxu0 %v3550_v48  ;;  %1705 = vmatprep.subr.mxu1 %v3551_v28 }
 0x59b   :  { %1635 = vmatpush1.msra.mxu0 %v3552_v46  ;;  %1668 = vmatprep.mubr.f32.mxu0 %v3553_v47 }
 0x59c   :  { %1706 = vmatpush1.msra.mxu1 %v3554_v50  ;;  %1739 = vmatprep.mubr.f32.mxu1 %v3553_v47  ;;  %v1397_v50 = vld [vmem:[#allocation3 + $0x5] ss:$8 sm:$0xf] }
 0x59d   :  { %1810 = vmatprep.subr.mxu0 %v3555_v5  ;;  %1881 = vmatprep.subr.mxu1 %v3556_v51 }
 0x63c   :  { %v1464_v2 = vpop.f32.mrf.mxu0  ;;  %v1535_v49 = vpop.f32.mrf.mxu1 }
 0x63e   :  { %v1466_v59 = vpop.f32.mrf.mxu0  ;;  %v1537_v25 = vpop.f32.mrf.mxu1 }
 0x63f   :  { %v1544_v57 = vcombine.low %v1464_v2, %v1466_v59  ;;  %v1545_v48 = vcombine.low %v1535_v49, %v1537_v25 }
 0x641   :  { %v1552_v28 = vrot.slane %v1544_v57, %v2741_v0  ;;  %v1559_v46 = vrot.slane %v1545_v48, %v2741_v0 }
 0x643   :  { %v1560_v62 = vcombine.low %v1552_v28, %v1559_v46 }
 0x645   :  { %v1567_v56 = vrot.slane %v1560_v62, %v2741_v0 }
 0x647   :  { %v1569_v61 = vadd.f32 %v1567_v56, %v1397_v50 }
 0x649   :  { %v2086_v47 = vmul.f32 -1.442695, %v1569_v61  ;;  %v1577_v60 = vrot.slane %v1569_v61, 1  ;;  %v1588_v51 = vrot.slane %v1569_v61, 3  ;;  %v1585_v4 = vrot.slane %v1569_v61, 2 }
 0x64b   :  { %2186 = vpow2.f32 %v2086_v47  ;;  %v2087_v5 = vmul.f32 -1.442695, %v1577_v60  ;;  %v2088_v55 = vmul.f32 -1.442695, %v1588_v51 }
 0x64d   :  { %2188 = vpow2.f32 %v2087_v5 }
 0x64e   :  { %2190 = vpow2.f32 %v2088_v55 }
 0x658   :  { %v2187_v45 = vpop.eup %2186 }
 0x659   :  { %v1573_v59 = vadd.f32 1.0, %v2187_v45 }
 0x65a   :  { %v2189_v2 = vpop.eup %2188 }
 0x65b   :  { %2192 = vrcp.f32 %v1573_v59  ;;  %v1582_v57 = vadd.f32 1.0, %v2189_v2  ;;  %v2191_v49 = vpop.eup %2190 }
 0x65c   :  { %2194 = vtanh.f32 %v1585_v4  ;;  %v1593_v50 = vadd.f32 1.0, %v2191_v49 }
 0x65d   :  { %2196 = vrcp.f32 %v1582_v57 }
 0x65e   :  { %2198 = vrcp.f32 %v1593_v50 }
 0x668   :  { %v2193_v62 = vpop.eup %2192 }
 0x669   :  { %v2195_v25 = vpop.eup %2194 }
 0x66a   :  { %v2197_v56 = vpop.eup %2196  ;;  %v1597_v60 = vmul.f32 %v2195_v25, %v2193_v62 }
 0x66b   :  { %v1596_v48 = vmul.f32 %v2197_v56, %v3166_v27  ;;  %v2199_v45 = vpop.eup %2198 }
 0x66d   :  { %v3239_v28 = vadd.f32 %v1597_v60, %v1596_v48 }
 0x66f   :  { %2200 = vtanh.f32 %v3239_v28 }
 0x67c   :  { %v2201_v61 = vpop.eup %2200 }
 0x67d   :  { %v1600_v55 = vmul.f32 %v2201_v61, %v2199_v45 }
 0x67f   :  { %1601 = vst [vmem:[#allocation2 + $0x5] sm:$0x1] %v1600_v55  ;;  %1669 = vmatmul.mubr.f32.vlgmr.msra.gmra.mxu0 %v1600_v55  ;;  %1740 = vmatmul.mubr.f32.vlgmr.msra.gmra.mxu1 %v1600_v55 }
 0x680   :  { %1811 = vmatpush1.msra.mxu0 %v2972_v54  ;;  %1882 = vmatpush1.msra.mxu1 %v2975_v63  ;;  %v3557_v54 = vld [vmem:[#allocation19_spill] sm:$0xff]  ;;  %v3558_v63 = vld [vmem:[#allocation21_spill] sm:$0xff] }
 0x681   :  { %1812 = vmatprep.subr.mxu0 %v2978_v58  ;;  %1883 = vmatprep.subr.mxu1 %v2981_v1  ;;  %v3559_v58 = vld [vmem:[#allocation22_spill] sm:$0xff]  ;;  %v3560_v1 = vld [vmem:[#allocation23_spill] sm:$0xff] }
 0x682   :  { %1813 = vmatpush1.msra.mxu0 %v2984_v52  ;;  %1884 = vmatpush1.msra.mxu1 %v2987_v53  ;;  %v3561_v52 = vld [vmem:[#allocation24_spill] sm:$0xff]  ;;  %v3562_v53 = vld [vmem:[#allocation25_spill] sm:$0xff] }
 0x683   :  { %1814 = vmatprep.subr.mxu0 %v2990_v6  ;;  %1885 = vmatprep.subr.mxu1 %v2993_v3  ;;  %v3563_v6 = vld [vmem:[#allocation26_spill] sm:$0xff]  ;;  %v3564_v3 = vld [vmem:[#allocation27_spill] sm:$0xff] }
 0x684   :  { %1815 = vmatpush1.msra.mxu0 %v2996_v7  ;;  %1886 = vmatpush1.msra.mxu1 %v2999_v8  ;;  %v3565_v7 = vld [vmem:[#allocation28_spill] sm:$0xff]  ;;  %v3566_v8 = vld [vmem:[#allocation29_spill] sm:$0xff] }
 0x685   :  { %1816 = vmatprep.subr.mxu0 %v3002_v9  ;;  %1887 = vmatprep.subr.mxu1 %v3005_v10  ;;  %v3567_v9 = vld [vmem:[#allocation30_spill] sm:$0xff]  ;;  %v3568_v10 = vld [vmem:[#allocation31_spill] sm:$0xff] }
 0x686   :  { %1817 = vmatpush1.msra.mxu0 %v3008_v11  ;;  %1888 = vmatpush1.msra.mxu1 %v3011_v12  ;;  %v3569_v11 = vld [vmem:[#allocation32_spill] sm:$0xff]  ;;  %v3570_v12 = vld [vmem:[#allocation33_spill] sm:$0xff] }
 0x687   :  { %1818 = vmatprep.subr.mxu0 %v3014_v13  ;;  %1889 = vmatprep.subr.mxu1 %v3017_v14  ;;  %v3571_v13 = vld [vmem:[#allocation34_spill] sm:$0xff]  ;;  %v3572_v14 = vld [vmem:[#allocation35_spill] sm:$0xff] }
 0x688   :  { %1819 = vmatpush1.msra.mxu0 %v3020_v15  ;;  %1890 = vmatpush1.msra.mxu1 %v3023_v16  ;;  %v3573_v15 = vld [vmem:[#allocation36_spill] sm:$0xff]  ;;  %v3574_v16 = vld [vmem:[#allocation37_spill] sm:$0xff] }
 0x689   :  { %1820 = vmatprep.subr.mxu0 %v3026_v17  ;;  %1891 = vmatprep.subr.mxu1 %v3029_v18  ;;  %v3575_v17 = vmov 0.0   ;;  %v3576_v18 = vld [vmem:[#allocation38_spill] sm:$0xff] }
 0x68a   :  { %1821 = vmatpush1.msra.mxu0 %v3032_v19  ;;  %1892 = vmatpush1.msra.mxu1 %v3035_v20 }
 0x68b   :  { %1822 = vmatprep.subr.mxu0 %v3038_v21  ;;  %1893 = vmatprep.subr.mxu1 %v3041_v22 }
 0x68c   :  { %1823 = vmatpush1.msra.mxu0 %v3044_v23  ;;  %1894 = vmatpush1.msra.mxu1 %v3047_v24 }
 0x68d   :  { %1824 = vmatprep.subr.mxu0 %v3050_v26  ;;  %1895 = vmatprep.subr.mxu1 %v3053_v29 }
 0x68e   :  { %1825 = vmatpush1.msra.mxu0 %v3056_v30  ;;  %1896 = vmatpush1.msra.mxu1 %v3059_v31 }
 0x68f   :  { %1826 = vmatprep.subr.mxu0 %v3062_v32  ;;  %1897 = vmatprep.subr.mxu1 %v3065_v33  ;;  %v1603_v32 = vld [vmem:[#allocation3 + $0x6] ss:$8 sm:$0xf] }
 0x690   :  { %1827 = vmatpush1.msra.mxu0 %v3068_v34  ;;  %1898 = vmatpush1.msra.mxu1 %v3071_v35 }
 0x691   :  { %1828 = vmatprep.subr.mxu0 %v3074_v36  ;;  %1899 = vmatprep.subr.mxu1 %v3077_v37 }
 0x692   :  { %1829 = vmatpush1.msra.mxu0 %v3080_v38  ;;  %1900 = vmatpush1.msra.mxu1 %v3083_v39 }
 0x693   :  { %1830 = vmatprep.subr.mxu0 %v3086_v40  ;;  %1901 = vmatprep.subr.mxu1 %v3089_v41 }
 0x694   :  { %1831 = vmatpush1.msra.mxu0 %v3092_v42  ;;  %1902 = vmatpush1.msra.mxu1 %v3095_v43 }
 0x695   :  { %1832 = vmatprep.subr.mxu0 %v3098_v44  ;;  %1903 = vmatprep.subr.mxu1 %v3557_v54  ;;  %v1809_v54 = vld [vmem:[#allocation3 + $0x7] ss:$8 sm:$0xf] }
 0x696   :  { %1833 = vmatpush1.msra.mxu0 %v3558_v63  ;;  %1904 = vmatpush1.msra.mxu1 %v3559_v58 }
 0x697   :  { %1834 = vmatprep.subr.mxu0 %v3560_v1  ;;  %1905 = vmatprep.subr.mxu1 %v3561_v52 }
 0x698   :  { %1835 = vmatpush1.msra.mxu0 %v3562_v53  ;;  %1906 = vmatpush1.msra.mxu1 %v3563_v6 }
 0x699   :  { %1836 = vmatprep.subr.mxu0 %v3564_v3  ;;  %1907 = vmatprep.subr.mxu1 %v3565_v7 }
 0x69a   :  { %1837 = vmatpush1.msra.mxu0 %v3566_v8  ;;  %1908 = vmatpush1.msra.mxu1 %v3567_v9 }
 0x69b   :  { %1838 = vmatprep.subr.mxu0 %v3568_v10  ;;  %1909 = vmatprep.subr.mxu1 %v3569_v11 }
 0x69c   :  { %1839 = vmatpush1.msra.mxu0 %v3570_v12  ;;  %1910 = vmatpush1.msra.mxu1 %v3571_v13 }
 0x69d   :  { %1840 = vmatprep.subr.mxu0 %v3572_v14  ;;  %1911 = vmatprep.subr.mxu1 %v3573_v15 }
 0x69e   :  { %1841 = vmatpush1.msra.mxu0 %v3574_v16  ;;  %1874 = vmatprep.mubr.f32.mxu0 %v3575_v17 }
 0x69f   :  { %1912 = vmatpush1.msra.mxu1 %v3576_v18  ;;  %1945 = vmatprep.mubr.f32.mxu1 %v3575_v17 }
 0x73f   :  { %v1670_v19 = vpop.f32.mrf.mxu0  ;;  %v1741_v20 = vpop.f32.mrf.mxu1 }
 0x741   :  { %v1672_v21 = vpop.f32.mrf.mxu0  ;;  %v1743_v22 = vpop.f32.mrf.mxu1 }
 0x742   :  { %v1750_v23 = vcombine.low %v1670_v19, %v1672_v21  ;;  %v1751_v24 = vcombine.low %v1741_v20, %v1743_v22  ;;  %v2095_v21 = vld [vmem:[%s3329_s4] ss:$0 sm:$0xff] }
 0x744   :  { %v1758_v26 = vrot.slane %v1750_v23, %v2741_v0  ;;  %v1765_v29 = vrot.slane %v1751_v24, %v2741_v0 }
 0x746   :  { %v1766_v30 = vcombine.low %v1758_v26, %v1765_v29 }
 0x748   :  { %v1773_v31 = vrot.slane %v1766_v30, %v2741_v0 }
 0x74a   :  { %v1775_v33 = vadd.f32 %v1773_v31, %v1603_v32 }
 0x74c   :  { %v2089_v34 = vmul.f32 -1.442695, %v1775_v33  ;;  %v1783_v35 = vrot.slane %v1775_v33, 1  ;;  %v1794_v37 = vrot.slane %v1775_v33, 3  ;;  %v1791_v40 = vrot.slane %v1775_v33, 2 }
 0x74e   :  { %2202 = vpow2.f32 %v2089_v34  ;;  %v2090_v36 = vmul.f32 -1.442695, %v1783_v35  ;;  %v2091_v38 = vmul.f32 -1.442695, %v1794_v37 }
 0x750   :  { %2204 = vpow2.f32 %v2090_v36 }
 0x751   :  { %2206 = vpow2.f32 %v2091_v38 }
 0x75b   :  { %v2203_v39 = vpop.eup %2202 }
 0x75c   :  { %v1779_v41 = vadd.f32 1.0, %v2203_v39 }
 0x75d   :  { %v2205_v42 = vpop.eup %2204 }
 0x75e   :  { %2208 = vrcp.f32 %v1779_v41  ;;  %v1788_v43 = vadd.f32 1.0, %v2205_v42  ;;  %v2207_v44 = vpop.eup %2206 }
 0x75f   :  { %2210 = vtanh.f32 %v1791_v40  ;;  %v1799_v47 = vadd.f32 1.0, %v2207_v44 }
 0x760   :  { %2212 = vrcp.f32 %v1788_v43 }
 0x761   :  { %2214 = vrcp.f32 %v1799_v47 }
 0x76b   :  { %v2209_v27 = vpop.eup %2208 }
 0x76c   :  { %v2211_v4 = vpop.eup %2210 }
 0x76d   :  { %v2213_v46 = vpop.eup %2212  ;;  %v1803_v51 = vmul.f32 %v2211_v4, %v2209_v27 }
 0x76e   :  { %v1802_v5 = vmul.f32 %v2213_v46, %v3239_v28  ;;  %v2215_v2 = vpop.eup %2214 }
 0x770   :  { %v1804_v59 = vadd.f32 %v1803_v51, %v1802_v5 }
 0x772   :  { %2216 = vtanh.f32 %v1804_v59 }
 0x77f   :  { %v2217_v57 = vpop.eup %2216 }
 0x780   :  { %v1806_v49 = vmul.f32 %v2217_v57, %v2215_v2 }
 0x782   :  { %1807 = vst [vmem:[#allocation2 + $0x6] sm:$0x1] %v1806_v49  ;;  %1875 = vmatmul.mubr.f32.vlgmr.msra.gmra.mxu0 %v1806_v49  ;;  %1946 = vmatmul.mubr.f32.vlgmr.msra.gmra.mxu1 %v1806_v49 }
 0x842   :  { %v1876_v62 = vpop.f32.mrf.mxu0  ;;  %v1947_v25 = vpop.f32.mrf.mxu1 }
 0x844   :  { %v1878_v56 = vpop.f32.mrf.mxu0  ;;  %v1949_v50 = vpop.f32.mrf.mxu1 }
 0x845   :  { %v1956_v48 = vcombine.low %v1876_v62, %v1878_v56  ;;  %v1957_v60 = vcombine.low %v1947_v25, %v1949_v50 }
 0x847   :  { %v1964_v45 = vrot.slane %v1956_v48, %v2741_v0  ;;  %v1971_v28 = vrot.slane %v1957_v60, %v2741_v0 }
 0x849   :  { %v1972_v61 = vcombine.low %v1964_v45, %v1971_v28 }
 0x84b   :  { %v1979_v55 = vrot.slane %v1972_v61, %v2741_v0 }
 0x84d   :  { %v1981_v63 = vadd.f32 %v1979_v55, %v1809_v54 }
 0x84f   :  { %v2092_v58 = vmul.f32 -1.442695, %v1981_v63  ;;  %v1989_v1 = vrot.slane %v1981_v63, 1  ;;  %v2000_v53 = vrot.slane %v1981_v63, 3  ;;  %v1997_v7 = vrot.slane %v1981_v63, 2 }
 0x851   :  { %2218 = vpow2.f32 %v2092_v58  ;;  %v2093_v52 = vmul.f32 -1.442695, %v1989_v1  ;;  %v2094_v6 = vmul.f32 -1.442695, %v2000_v53 }
 0x853   :  { %2220 = vpow2.f32 %v2093_v52 }
 0x854   :  { %2222 = vpow2.f32 %v2094_v6 }
 0x85e   :  { %v2219_v3 = vpop.eup %2218 }
 0x85f   :  { %v1985_v8 = vadd.f32 1.0, %v2219_v3 }
 0x860   :  { %v2221_v9 = vpop.eup %2220 }
 0x861   :  { %2224 = vrcp.f32 %v1985_v8  ;;  %v1994_v10 = vadd.f32 1.0, %v2221_v9  ;;  %v2223_v11 = vpop.eup %2222 }
 0x862   :  { %2226 = vtanh.f32 %v1997_v7  ;;  %v2005_v14 = vadd.f32 1.0, %v2223_v11 }
 0x863   :  { %2228 = vrcp.f32 %v1994_v10 }
 0x864   :  { %2230 = vrcp.f32 %v2005_v14 }
 0x86e   :  { %v2225_v0 = vpop.eup %2224 }
 0x86f   :  { %v2227_v12 = vpop.eup %2226 }
 0x870   :  { %v2229_v13 = vpop.eup %2228  ;;  %v2009_v16 = vmul.f32 %v2227_v12, %v2225_v0 }
 0x871   :  { %v2008_v15 = vmul.f32 %v2229_v13, %v1804_v59  ;;  %v2231_v18 = vpop.eup %2230 }
 0x873   :  { %v2010_v17 = vadd.f32 %v2009_v16, %v2008_v15 }
 0x875   :  { %2232 = vtanh.f32 %v2010_v17  ;;  %2036 = vst [vmem:[#allocation12] sm:$0x1] %v2010_v17 }
 0x882   :  { %v2233_v19 = vpop.eup %2232 }
 0x883   :  { %v2012_v20 = vmul.f32 %v2233_v19, %v2231_v18 }
 0x885   :  { %2013 = vst [vmem:[#allocation2 + $0x7] sm:$0x1] %v2012_v20  ;;  %2035 = vst [vmem:[#allocation11] sm:$0x1] %v2012_v20 }
 0x88c   :  { %v2014_v22 = vld [vmem:[#allocation2] sm:$0xff] }
 0x88d   :  { %v2022_v23 = vmul.f32 %v2095_v21, %v2014_v22 }
 0x88f   :  { %2023 = vadd.xlane.f32.xlu0 %v2022_v23 }
 0x890   :  { %2369 = shalt.err (!%p2366_p5)
}
 0x891   :  { %2048 = dma.vmem_to_hbm [thread:$0]  %s2046_s24, 16, %s3332_s7, [#allocation7]  }
 0x892   :  { %s2378_s4 = scalar_lea.vmem %s2056_s26, 16  ;;  %s2382_s9 = scalar_lea.vmem %s2056_s26, 32 }
 0x893   :  { %p2379_p6 = scmp.ne.s32.totalorder %s2056_s26, %s2378_s4  ;;  %p2383_p7 = scmp.lt.s32.totalorder %s2056_s26, %s2056_s26 }
 0x894   :  { %p2384_p8 = scmp.lt.s32.totalorder %s2382_s9, %s2378_s4 }
 0x896   :  { %p2385_p9 = por %p2384_p8, %p2383_p7 }
 0x898   :  { %p2386_p10 = pnand %p2385_p9, %p2379_p6 }
 0x89a   :  { %2389 = shalt.err (!%p2386_p10)
}
 0x89b   :  { %2058 = dma.vmem_to_hbm [thread:$0]  %s2056_s26, 16, %s3333_s8, [#allocation13]   ;;  %v2096_v24 = vld [vmem:[#allocation4] ss:$0 sm:$0xff]  ;;  %vm2033_vm0 = vcmask 7168  }
 0x918   :  { %v2024_v26 = vpop.xlane.xlu0 %2023 }
 0x919   :  { %v2032_v29 = vadd.f32 %v2096_v24, %v2024_v26 }
 0x91b   :  { %2034 = vst.msk [vmem:[%s3331_s6] sm:$0xff] %vm2033_vm0, %v2032_v29 }
 0x91c   :  { %2402 = dma.done.wait [#allocation7], 16  }
 0x91d   :  { %2403 = vsyncadd [#allocation7], 4294967280 }
 0x91e   :  { %2404 = dma.done.wait [#allocation13], 16  }
 0x91f   :  { %2405 = vsyncadd [#allocation13], 4294967280 }
 0x920   :  { %2067 = vsyncpa [#allocation6], 1 }
 0x921   :  { %2068 = vsyncpa [#allocation9], 1 }
 0x922   :  { %2069 = vsyncpa [#allocation7], 1 }
 0x923   :  { %2070 = vsyncpa [#allocation13], 1 }

</bundles_post_ra>
